<compile_context>
chip_gen: v5e
topology: v5e:2x2
jax: 0.10.0
libtpu: 0.0.40
codegen_flags: <defaults>
</compile_context>

<pallas_src>
import jax
import jax.numpy as jnp
from jax import lax
from jax.experimental import pallas as pl
from jax.experimental.pallas import tpu as pltpu

# ---- model hyper-params (small, consistent with the module's forward) ----
MEL_N_CHANNELS = 32     # mel_n_channels
HIDDEN = 32             # model_hidden_size
EMBED = 32              # model_embedding_size
NUM_LAYERS = 3          # model_num_layers
BATCH = 2
SEQ = 8

GROUP = 128             # padded lane width of one gate group (3H=96 -> 128)


def speaker_encoder_kernel(x_ref, w_rec_ref, w_in_ref, w_out_ref, out_ref):
    TB, D = x_ref.shape               # (T*B, D_mel), time-major: row = t*B + b
    B, E = out_ref.shape
    T = TB // B
    H = HIDDEN
    SH = NUM_LAYERS * H               # 96  : packed state width [h0|h1|h2]
    GW = 4 * GROUP                    # 512 : packed/padded gate width

    # ---- prologue (off the recurrence critical path) ----------------------
    w_rec = w_rec_ref[...]                                    # (SH, GW)
    bias_row = w_in_ref[D:D + 1, :]                           # (1, GW)
    bb = jnp.broadcast_to(bias_row, (B, GW))                  # hoisted broadcast
    # Hoisted layer-0 input projection for ALL timesteps (+ biases folded in):
    xadd = (jnp.dot(x_ref[...], w_in_ref[0:D, :],
                    preferred_element_type=jnp.float32)
            + jnp.broadcast_to(bias_row, (TB, GW)))           # (T*B, GW)

    lane = lax.broadcasted_iota(jnp.int32, (B, SH), 1)
    keep_l0 = (lane < H).astype(jnp.float32)        # after wavefront step 0
    keep_l01 = (lane < 2 * H).astype(jnp.float32)   # after wavefront step 1

    hcat = jnp.zeros((B, SH), jnp.float32)          # [h0 | h1 | h2]
    ccat = jnp.zeros((B, SH), jnp.float32)          # [c0 | c1 | c2]

    # ---- wavefront recurrence: step s = (layer0@s, layer1@s-1, layer2@s-2) --
    # One block-diagonal matmul + one fused cell per step; T=8 is a trace-time
    # constant so the loop is fully unrolled and h/c stay in vregs.
    for s in range(T + NUM_LAYERS - 1):
        add = xadd[s * B:(s + 1) * B, :] if s < T else bb
        gates = jnp.dot(hcat, w_rec, preferred_element_type=jnp.float32) + add
        sg = jax.nn.sigmoid(gates)                  # one sigmoid over all gates
        g_act = jnp.tanh(gates[:, 2 * GROUP:2 * GROUP + SH])
        c_new = sg[:, GROUP:GROUP + SH] * ccat + sg[:, 0:SH] * g_act
        h_new = sg[:, 3 * GROUP:3 * GROUP + SH] * jnp.tanh(c_new)
        if s == 0:          # layers 1,2 have not started yet: keep state at 0
            h_new = h_new * keep_l0
            c_new = c_new * keep_l0
        elif s == 1:        # layer 2 has not started yet
            h_new = h_new * keep_l01
            c_new = c_new * keep_l01
        hcat, ccat = h_new, c_new

    # ---- epilogue: hidden[-1] -> Linear -> ReLU -> L2-normalize -----------
    # hidden[-1] (h2) lives in lanes [2H:3H]; the selection is folded into the
    # zero-padded linear weight, so no lane relayout is needed.
    emb = (jnp.dot(hcat, w_out_ref[0:SH, :], preferred_element_type=jnp.float32)
           + w_out_ref[SH:SH + 1, :])
    emb = jnp.maximum(emb, 0.0)                     # ReLU
    # NOTE: no epsilon, matching PyTorch `embeds_raw / torch.norm(...)` exactly
    # (an all-zero ReLU row would produce NaN in both implementations).
    ssum = jnp.sum(emb * emb, axis=1, keepdims=True)
    out_ref[...] = (emb * lax.rsqrt(ssum)).astype(out_ref.dtype)


def pack_params(params):
    """One-time packing of nn.LSTM / nn.Linear weights into the wavefront
    block-diagonal slabs used by the kernel (done once, outside the jit).

    Gate layout of the packed gate vector (width 4*GROUP=512):
      group g in {i,f,g,o} occupies lanes [g*128, g*128+96) split per layer
      (layer l at lanes [g*128 + l*32, g*128 + (l+1)*32)); lanes 96:128 pad.
    """
    H, D, E = HIDDEN, MEL_N_CHANNELS, EMBED
    SH = NUM_LAYERS * H
    GW = 4 * GROUP
    (wih0, whh0, b0), (wih1, whh1, b1), (wih2, whh2, b2) = params["lstm"]
    wlin, blin = params["linear"]

    def place(dst, src, row_off, layer):
        # Scatter the 4 gate chunks (i,f,g,o) of `src` (rows, 4H) into the
        # padded gate groups at this layer's lane offset.
        for g in range(4):
            dst = dst.at[row_off:row_off + src.shape[0],
                         g * GROUP + layer * H: g * GROUP + (layer + 1) * H].set(
                             src[:, g * H:(g + 1) * H])
        return dst

    # Recurrent block-diagonal weight: rows index the packed state [h0|h1|h2].
    w_rec = jnp.zeros((SH, GW), jnp.float32)
    w_rec = place(w_rec, whh0, 0 * H, 0)   # h0 -> layer0 gates
    w_rec = place(w_rec, wih1, 0 * H, 1)   # h0 -> layer1 gates
    w_rec = place(w_rec, whh1, 1 * H, 1)   # h1 -> layer1 gates
    w_rec = place(w_rec, wih2, 1 * H, 2)   # h1 -> layer2 gates
    w_rec = place(w_rec, whh2, 2 * H, 2)   # h2 -> layer2 gates

    # Hoisted layer-0 input projection + all-layer biases in one slab.
    w_in = jnp.zeros((D + 1, GW), jnp.float32)
    w_in = place(w_in, wih0, 0, 0)                 # x_t -> layer0 gates
    bias = jnp.zeros((1, GW), jnp.float32)
    for layer, b in enumerate((b0, b1, b2)):
        bias = place(bias, b, 0, layer)
    w_in = w_in.at[D:D + 1, :].set(bias)           # last row = packed bias

    # Output linear padded to consume the packed state directly
    # (rows 0:2H are zero -> picks out h2 = hidden[-1]); last row = bias.
    w_out = jnp.zeros((SH + 1, E), jnp.float32)
    w_out = w_out.at[2 * H:3 * H, :].set(wlin)
    w_out = w_out.at[SH:SH + 1, :].set(blin)
    return w_rec, w_in, w_out


@jax.jit
def speaker_encoder_forward(mels, w_rec, w_in, w_out):
    """mels: (B, T, D_mel) float32, batch_first like the PyTorch module."""
    B, T, D = mels.shape
    # Time-major, flattened to rows (row = t*B + b); 2 KB wrapper transpose.
    x2d = jnp.swapaxes(mels, 0, 1).reshape(T * B, D)
    vmem = pl.BlockSpec(memory_space=pltpu.MemorySpace.VMEM)   # whole-array VMEM
    return pl.pallas_call(
        speaker_encoder_kernel,
        out_shape=jax.ShapeDtypeStruct((B, EMBED), jnp.float32),
        in_specs=[vmem] * 4,
        out_specs=vmem,
    )(x2d, w_rec, w_in, w_out)


def init_params(key):
    """Deterministic synthetic params, matching nn.LSTM / nn.Linear shapes.

    LSTM layer l: weight_ih (4H, in), weight_hh (4H, H), bias_ih + bias_hh (4H,)
    Stored pre-transposed: (in, 4H), (H, 4H), combined bias (1, 4H).
    Linear: weight (E, H) -> stored (H, E); bias (E,) -> (1, E).
    """
    H, E, D = HIDDEN, EMBED, MEL_N_CHANNELS
    k = 1.0 / jnp.sqrt(jnp.float32(H))
    keys = jax.random.split(key, 4 * NUM_LAYERS + 2)
    lstm = []
    idx = 0
    for l in range(NUM_LAYERS):
        in_dim = D if l == 0 else H
        wih = jax.random.uniform(keys[idx], (in_dim, 4 * H), jnp.float32, -k, k); idx += 1
        whh = jax.random.uniform(keys[idx], (H, 4 * H), jnp.float32, -k, k); idx += 1
        bih = jax.random.uniform(keys[idx], (1, 4 * H), jnp.float32, -k, k); idx += 1
        bhh = jax.random.uniform(keys[idx], (1, 4 * H), jnp.float32, -k, k); idx += 1
        lstm.append((wih, whh, bih + bhh))
    wlin = jax.random.uniform(keys[idx], (H, E), jnp.float32, -k, k); idx += 1
    blin = jax.random.uniform(keys[idx], (1, E), jnp.float32, -k, k)
    return {"lstm": tuple(lstm), "linear": (wlin, blin)}


def reference_forward(mels, params):
    """Pure-JAX reference (lax.scan LSTM) for correctness checking."""
    H = HIDDEN
    B = mels.shape[0]
    x = mels
    h_last = None
    for l in range(NUM_LAYERS):
        wih, whh, b = params["lstm"][l]

        def step(carry, xt, wih=wih, whh=whh, b=b):
            h, c = carry
            gates = xt @ wih + h @ whh + b
            i = jax.nn.sigmoid(gates[:, :H])
            f = jax.nn.sigmoid(gates[:, H:2 * H])
            g = jnp.tanh(gates[:, 2 * H:3 * H])
            o = jax.nn.sigmoid(gates[:, 3 * H:4 * H])
            c = f * c + i * g
            h = o * jnp.tanh(c)
            return (h, c), h

        init = (jnp.zeros((B, H), jnp.float32), jnp.zeros((B, H), jnp.float32))
        (h_last, _), ys = lax.scan(step, init, jnp.swapaxes(x, 0, 1))
        x = jnp.swapaxes(ys, 0, 1)
    wlin, blin = params["linear"]
    emb = jnp.maximum(h_last @ wlin + blin, 0.0)
    return emb / jnp.linalg.norm(emb, axis=1, keepdims=True)


if __name__ == "__main__":
    key = jax.random.PRNGKey(0)
    k_param, k_data = jax.random.split(key)
    params = init_params(k_param)
    mels = jax.random.normal(k_data, (BATCH, SEQ, MEL_N_CHANNELS), jnp.float32)

    # One-time weight packing (outside the jitted forward).
    w_rec, w_in, w_out = pack_params(params)

    out = speaker_encoder_forward(mels, w_rec, w_in, w_out)
    out = jax.block_until_ready(out)

    ref = reference_forward(mels, params)
    assert out.shape == (BATCH, EMBED)
    assert jnp.allclose(out, ref, atol=1e-4, rtol=1e-4), (out, ref)

    print("KERNEL_OK")
</pallas_src>

<mosaic_0001>
module attributes {stable_mosaic.version = 11 : i64} {
  func.func @speaker_encoder_kernel(%arg0: memref<16x32xf32, #tpu.memory_space<vmem>>, %arg1: memref<96x512xf32, #tpu.memory_space<vmem>>, %arg2: memref<33x512xf32, #tpu.memory_space<vmem>>, %arg3: memref<97x32xf32, #tpu.memory_space<vmem>>, %arg4: memref<2x32xf32, #tpu.memory_space<vmem>>) attributes {dimension_semantics = [], scalar_prefetch = 0 : i64, scratch_operands = 0 : i64, tpu.core_type = #tpu.core_type<tc>} {
    %c0 = arith.constant 0 : index
    %c0_0 = arith.constant 0 : index
    %0 = vector.load %arg1[%c0, %c0_0] : memref<96x512xf32, #tpu.memory_space<vmem>>, vector<96x512xf32>
    %c32 = arith.constant 32 : index
    %c0_1 = arith.constant 0 : index
    %1 = vector.load %arg2[%c32, %c0_1] : memref<33x512xf32, #tpu.memory_space<vmem>>, vector<1x512xf32>
    %2 = vector.shape_cast %1 : vector<1x512xf32> to vector<1x512xf32>
    %3 = vector.broadcast %2 : vector<1x512xf32> to vector<2x512xf32>
    %c0_2 = arith.constant 0 : index
    %c0_3 = arith.constant 0 : index
    %4 = vector.load %arg0[%c0_2, %c0_3] : memref<16x32xf32, #tpu.memory_space<vmem>>, vector<16x32xf32>
    %c0_4 = arith.constant 0 : index
    %c0_5 = arith.constant 0 : index
    %5 = vector.load %arg2[%c0_4, %c0_5] : memref<33x512xf32, #tpu.memory_space<vmem>>, vector<32x512xf32>
    %cst = arith.constant dense<0.000000e+00> : vector<16x512xf32>
    %6 = tpu.matmul %4, %5, %cst {dimension_numbers = #tpu.dot_dimension_numbers<[1], [0], [0], [1], [0, 0, 1, 1], [], []>} : vector<16x32xf32>, vector<32x512xf32>, vector<16x512xf32> -> vector<16x512xf32>
    %7 = vector.shape_cast %1 : vector<1x512xf32> to vector<1x512xf32>
    %8 = vector.broadcast %7 : vector<1x512xf32> to vector<16x512xf32>
    %9 = arith.addf %6, %8 : vector<16x512xf32>
    %10 = tpu.iota {dimensions = array<i32: 1>} : vector<2x96xi32>
    %c32_i32 = arith.constant 32 : i32
    %11 = vector.broadcast %c32_i32 : i32 to vector<2x96xi32>
    %12 = arith.cmpi slt, %10, %11 : vector<2x96xi32>
    %13 = arith.extui %12 : vector<2x96xi1> to vector<2x96xi32>
    %14 = arith.sitofp %13 : vector<2x96xi32> to vector<2x96xf32>
    %c64_i32 = arith.constant 64 : i32
    %15 = vector.broadcast %c64_i32 : i32 to vector<2x96xi32>
    %16 = arith.cmpi slt, %10, %15 : vector<2x96xi32>
    %17 = arith.extui %16 : vector<2x96xi1> to vector<2x96xi32>
    %18 = arith.sitofp %17 : vector<2x96xi32> to vector<2x96xf32>
    %cst_6 = arith.constant 0.000000e+00 : f32
    %19 = vector.broadcast %cst_6 : f32 to vector<2x96xf32>
    %cst_7 = arith.constant 0.000000e+00 : f32
    %20 = vector.broadcast %cst_7 : f32 to vector<2x96xf32>
    %21 = vector.extract_strided_slice %9 {offsets = [0, 0], sizes = [2, 512], strides = [1, 1]} : vector<16x512xf32> to vector<2x512xf32>
    %cst_8 = arith.constant dense<0.000000e+00> : vector<2x512xf32>
    %22 = tpu.matmul %19, %0, %cst_8 {dimension_numbers = #tpu.dot_dimension_numbers<[1], [0], [0], [1], [0, 0, 1, 1], [], []>} : vector<2x96xf32>, vector<96x512xf32>, vector<2x512xf32> -> vector<2x512xf32>
    %23 = arith.addf %22, %21 : vector<2x512xf32>
    %24 = arith.negf %23 : vector<2x512xf32>
    %25 = math.exp %24 : vector<2x512xf32>
    %cst_9 = arith.constant 1.000000e+00 : f32
    %26 = vector.broadcast %cst_9 : f32 to vector<2x512xf32>
    %27 = arith.addf %26, %25 : vector<2x512xf32>
    %28 = arith.divf %26, %27 : vector<2x512xf32>
    %29 = vector.extract_strided_slice %23 {offsets = [0, 256], sizes = [2, 96], strides = [1, 1]} : vector<2x512xf32> to vector<2x96xf32>
    %30 = math.tanh %29 : vector<2x96xf32>
    %31 = vector.extract_strided_slice %28 {offsets = [0, 128], sizes = [2, 96], strides = [1, 1]} : vector<2x512xf32> to vector<2x96xf32>
    %32 = arith.mulf %31, %20 : vector<2x96xf32>
    %33 = vector.extract_strided_slice %28 {offsets = [0, 0], sizes = [2, 96], strides = [1, 1]} : vector<2x512xf32> to vector<2x96xf32>
    %34 = arith.mulf %33, %30 : vector<2x96xf32>
    %35 = arith.addf %32, %34 : vector<2x96xf32>
    %36 = vector.extract_strided_slice %28 {offsets = [0, 384], sizes = [2, 96], strides = [1, 1]} : vector<2x512xf32> to vector<2x96xf32>
    %37 = math.tanh %35 : vector<2x96xf32>
    %38 = arith.mulf %36, %37 : vector<2x96xf32>
    %39 = arith.mulf %38, %14 : vector<2x96xf32>
    %40 = arith.mulf %35, %14 : vector<2x96xf32>
    %41 = vector.extract_strided_slice %9 {offsets = [2, 0], sizes = [2, 512], strides = [1, 1]} : vector<16x512xf32> to vector<2x512xf32>
    %cst_10 = arith.constant dense<0.000000e+00> : vector<2x512xf32>
    %42 = tpu.matmul %39, %0, %cst_10 {dimension_numbers = #tpu.dot_dimension_numbers<[1], [0], [0], [1], [0, 0, 1, 1], [], []>} : vector<2x96xf32>, vector<96x512xf32>, vector<2x512xf32> -> vector<2x512xf32>
    %43 = arith.addf %42, %41 : vector<2x512xf32>
    %44 = arith.negf %43 : vector<2x512xf32>
    %45 = math.exp %44 : vector<2x512xf32>
    %cst_11 = arith.constant 1.000000e+00 : f32
    %46 = vector.broadcast %cst_11 : f32 to vector<2x512xf32>
    %47 = arith.addf %46, %45 : vector<2x512xf32>
    %48 = arith.divf %46, %47 : vector<2x512xf32>
    %49 = vector.extract_strided_slice %43 {offsets = [0, 256], sizes = [2, 96], strides = [1, 1]} : vector<2x512xf32> to vector<2x96xf32>
    %50 = math.tanh %49 : vector<2x96xf32>
    %51 = vector.extract_strided_slice %48 {offsets = [0, 128], sizes = [2, 96], strides = [1, 1]} : vector<2x512xf32> to vector<2x96xf32>
    %52 = arith.mulf %51, %40 : vector<2x96xf32>
    %53 = vector.extract_strided_slice %48 {offsets = [0, 0], sizes = [2, 96], strides = [1, 1]} : vector<2x512xf32> to vector<2x96xf32>
    %54 = arith.mulf %53, %50 : vector<2x96xf32>
    %55 = arith.addf %52, %54 : vector<2x96xf32>
    %56 = vector.extract_strided_slice %48 {offsets = [0, 384], sizes = [2, 96], strides = [1, 1]} : vector<2x512xf32> to vector<2x96xf32>
    %57 = math.tanh %55 : vector<2x96xf32>
    %58 = arith.mulf %56, %57 : vector<2x96xf32>
    %59 = arith.mulf %58, %18 : vector<2x96xf32>
    %60 = arith.mulf %55, %18 : vector<2x96xf32>
    %61 = vector.extract_strided_slice %9 {offsets = [4, 0], sizes = [2, 512], strides = [1, 1]} : vector<16x512xf32> to vector<2x512xf32>
    %cst_12 = arith.constant dense<0.000000e+00> : vector<2x512xf32>
    %62 = tpu.matmul %59, %0, %cst_12 {dimension_numbers = #tpu.dot_dimension_numbers<[1], [0], [0], [1], [0, 0, 1, 1], [], []>} : vector<2x96xf32>, vector<96x512xf32>, vector<2x512xf32> -> vector<2x512xf32>
    %63 = arith.addf %62, %61 : vector<2x512xf32>
    %64 = arith.negf %63 : vector<2x512xf32>
    %65 = math.exp %64 : vector<2x512xf32>
    %cst_13 = arith.constant 1.000000e+00 : f32
    %66 = vector.broadcast %cst_13 : f32 to vector<2x512xf32>
    %67 = arith.addf %66, %65 : vector<2x512xf32>
    %68 = arith.divf %66, %67 : vector<2x512xf32>
    %69 = vector.extract_strided_slice %63 {offsets = [0, 256], sizes = [2, 96], strides = [1, 1]} : vector<2x512xf32> to vector<2x96xf32>
    %70 = math.tanh %69 : vector<2x96xf32>
    %71 = vector.extract_strided_slice %68 {offsets = [0, 128], sizes = [2, 96], strides = [1, 1]} : vector<2x512xf32> to vector<2x96xf32>
    %72 = arith.mulf %71, %60 : vector<2x96xf32>
    %73 = vector.extract_strided_slice %68 {offsets = [0, 0], sizes = [2, 96], strides = [1, 1]} : vector<2x512xf32> to vector<2x96xf32>
    %74 = arith.mulf %73, %70 : vector<2x96xf32>
    %75 = arith.addf %72, %74 : vector<2x96xf32>
    %76 = vector.extract_strided_slice %68 {offsets = [0, 384], sizes = [2, 96], strides = [1, 1]} : vector<2x512xf32> to vector<2x96xf32>
    %77 = math.tanh %75 : vector<2x96xf32>
    %78 = arith.mulf %76, %77 : vector<2x96xf32>
    %79 = vector.extract_strided_slice %9 {offsets = [6, 0], sizes = [2, 512], strides = [1, 1]} : vector<16x512xf32> to vector<2x512xf32>
    %cst_14 = arith.constant dense<0.000000e+00> : vector<2x512xf32>
    %80 = tpu.matmul %78, %0, %cst_14 {dimension_numbers = #tpu.dot_dimension_numbers<[1], [0], [0], [1], [0, 0, 1, 1], [], []>} : vector<2x96xf32>, vector<96x512xf32>, vector<2x512xf32> -> vector<2x512xf32>
    %81 = arith.addf %80, %79 : vector<2x512xf32>
    %82 = arith.negf %81 : vector<2x512xf32>
    %83 = math.exp %82 : vector<2x512xf32>
    %cst_15 = arith.constant 1.000000e+00 : f32
    %84 = vector.broadcast %cst_15 : f32 to vector<2x512xf32>
    %85 = arith.addf %84, %83 : vector<2x512xf32>
    %86 = arith.divf %84, %85 : vector<2x512xf32>
    %87 = vector.extract_strided_slice %81 {offsets = [0, 256], sizes = [2, 96], strides = [1, 1]} : vector<2x512xf32> to vector<2x96xf32>
    %88 = math.tanh %87 : vector<2x96xf32>
    %89 = vector.extract_strided_slice %86 {offsets = [0, 128], sizes = [2, 96], strides = [1, 1]} : vector<2x512xf32> to vector<2x96xf32>
    %90 = arith.mulf %89, %75 : vector<2x96xf32>
    %91 = vector.extract_strided_slice %86 {offsets = [0, 0], sizes = [2, 96], strides = [1, 1]} : vector<2x512xf32> to vector<2x96xf32>
    %92 = arith.mulf %91, %88 : vector<2x96xf32>
    %93 = arith.addf %90, %92 : vector<2x96xf32>
    %94 = vector.extract_strided_slice %86 {offsets = [0, 384], sizes = [2, 96], strides = [1, 1]} : vector<2x512xf32> to vector<2x96xf32>
    %95 = math.tanh %93 : vector<2x96xf32>
    %96 = arith.mulf %94, %95 : vector<2x96xf32>
    %97 = vector.extract_strided_slice %9 {offsets = [8, 0], sizes = [2, 512], strides = [1, 1]} : vector<16x512xf32> to vector<2x512xf32>
    %cst_16 = arith.constant dense<0.000000e+00> : vector<2x512xf32>
    %98 = tpu.matmul %96, %0, %cst_16 {dimension_numbers = #tpu.dot_dimension_numbers<[1], [0], [0], [1], [0, 0, 1, 1], [], []>} : vector<2x96xf32>, vector<96x512xf32>, vector<2x512xf32> -> vector<2x512xf32>
    %99 = arith.addf %98, %97 : vector<2x512xf32>
    %100 = arith.negf %99 : vector<2x512xf32>
    %101 = math.exp %100 : vector<2x512xf32>
    %cst_17 = arith.constant 1.000000e+00 : f32
    %102 = vector.broadcast %cst_17 : f32 to vector<2x512xf32>
    %103 = arith.addf %102, %101 : vector<2x512xf32>
    %104 = arith.divf %102, %103 : vector<2x512xf32>
    %105 = vector.extract_strided_slice %99 {offsets = [0, 256], sizes = [2, 96], strides = [1, 1]} : vector<2x512xf32> to vector<2x96xf32>
    %106 = math.tanh %105 : vector<2x96xf32>
    %107 = vector.extract_strided_slice %104 {offsets = [0, 128], sizes = [2, 96], strides = [1, 1]} : vector<2x512xf32> to vector<2x96xf32>
    %108 = arith.mulf %107, %93 : vector<2x96xf32>
    %109 = vector.extract_strided_slice %104 {offsets = [0, 0], sizes = [2, 96], strides = [1, 1]} : vector<2x512xf32> to vector<2x96xf32>
    %110 = arith.mulf %109, %106 : vector<2x96xf32>
    %111 = arith.addf %108, %110 : vector<2x96xf32>
    %112 = vector.extract_strided_slice %104 {offsets = [0, 384], sizes = [2, 96], strides = [1, 1]} : vector<2x512xf32> to vector<2x96xf32>
    %113 = math.tanh %111 : vector<2x96xf32>
    %114 = arith.mulf %112, %113 : vector<2x96xf32>
    %115 = vector.extract_strided_slice %9 {offsets = [10, 0], sizes = [2, 512], strides = [1, 1]} : vector<16x512xf32> to vector<2x512xf32>
    %cst_18 = arith.constant dense<0.000000e+00> : vector<2x512xf32>
    %116 = tpu.matmul %114, %0, %cst_18 {dimension_numbers = #tpu.dot_dimension_numbers<[1], [0], [0], [1], [0, 0, 1, 1], [], []>} : vector<2x96xf32>, vector<96x512xf32>, vector<2x512xf32> -> vector<2x512xf32>
    %117 = arith.addf %116, %115 : vector<2x512xf32>
    %118 = arith.negf %117 : vector<2x512xf32>
    %119 = math.exp %118 : vector<2x512xf32>
    %cst_19 = arith.constant 1.000000e+00 : f32
    %120 = vector.broadcast %cst_19 : f32 to vector<2x512xf32>
    %121 = arith.addf %120, %119 : vector<2x512xf32>
    %122 = arith.divf %120, %121 : vector<2x512xf32>
    %123 = vector.extract_strided_slice %117 {offsets = [0, 256], sizes = [2, 96], strides = [1, 1]} : vector<2x512xf32> to vector<2x96xf32>
    %124 = math.tanh %123 : vector<2x96xf32>
    %125 = vector.extract_strided_slice %122 {offsets = [0, 128], sizes = [2, 96], strides = [1, 1]} : vector<2x512xf32> to vector<2x96xf32>
    %126 = arith.mulf %125, %111 : vector<2x96xf32>
    %127 = vector.extract_strided_slice %122 {offsets = [0, 0], sizes = [2, 96], strides = [1, 1]} : vector<2x512xf32> to vector<2x96xf32>
    %128 = arith.mulf %127, %124 : vector<2x96xf32>
    %129 = arith.addf %126, %128 : vector<2x96xf32>
    %130 = vector.extract_strided_slice %122 {offsets = [0, 384], sizes = [2, 96], strides = [1, 1]} : vector<2x512xf32> to vector<2x96xf32>
    %131 = math.tanh %129 : vector<2x96xf32>
    %132 = arith.mulf %130, %131 : vector<2x96xf32>
    %133 = vector.extract_strided_slice %9 {offsets = [12, 0], sizes = [2, 512], strides = [1, 1]} : vector<16x512xf32> to vector<2x512xf32>
    %cst_20 = arith.constant dense<0.000000e+00> : vector<2x512xf32>
    %134 = tpu.matmul %132, %0, %cst_20 {dimension_numbers = #tpu.dot_dimension_numbers<[1], [0], [0], [1], [0, 0, 1, 1], [], []>} : vector<2x96xf32>, vector<96x512xf32>, vector<2x512xf32> -> vector<2x512xf32>
    %135 = arith.addf %134, %133 : vector<2x512xf32>
    %136 = arith.negf %135 : vector<2x512xf32>
    %137 = math.exp %136 : vector<2x512xf32>
    %cst_21 = arith.constant 1.000000e+00 : f32
    %138 = vector.broadcast %cst_21 : f32 to vector<2x512xf32>
    %139 = arith.addf %138, %137 : vector<2x512xf32>
    %140 = arith.divf %138, %139 : vector<2x512xf32>
    %141 = vector.extract_strided_slice %135 {offsets = [0, 256], sizes = [2, 96], strides = [1, 1]} : vector<2x512xf32> to vector<2x96xf32>
    %142 = math.tanh %141 : vector<2x96xf32>
    %143 = vector.extract_strided_slice %140 {offsets = [0, 128], sizes = [2, 96], strides = [1, 1]} : vector<2x512xf32> to vector<2x96xf32>
    %144 = arith.mulf %143, %129 : vector<2x96xf32>
    %145 = vector.extract_strided_slice %140 {offsets = [0, 0], sizes = [2, 96], strides = [1, 1]} : vector<2x512xf32> to vector<2x96xf32>
    %146 = arith.mulf %145, %142 : vector<2x96xf32>
    %147 = arith.addf %144, %146 : vector<2x96xf32>
    %148 = vector.extract_strided_slice %140 {offsets = [0, 384], sizes = [2, 96], strides = [1, 1]} : vector<2x512xf32> to vector<2x96xf32>
    %149 = math.tanh %147 : vector<2x96xf32>
    %150 = arith.mulf %148, %149 : vector<2x96xf32>
    %151 = vector.extract_strided_slice %9 {offsets = [14, 0], sizes = [2, 512], strides = [1, 1]} : vector<16x512xf32> to vector<2x512xf32>
    %cst_22 = arith.constant dense<0.000000e+00> : vector<2x512xf32>
    %152 = tpu.matmul %150, %0, %cst_22 {dimension_numbers = #tpu.dot_dimension_numbers<[1], [0], [0], [1], [0, 0, 1, 1], [], []>} : vector<2x96xf32>, vector<96x512xf32>, vector<2x512xf32> -> vector<2x512xf32>
    %153 = arith.addf %152, %151 : vector<2x512xf32>
    %154 = arith.negf %153 : vector<2x512xf32>
    %155 = math.exp %154 : vector<2x512xf32>
    %cst_23 = arith.constant 1.000000e+00 : f32
    %156 = vector.broadcast %cst_23 : f32 to vector<2x512xf32>
    %157 = arith.addf %156, %155 : vector<2x512xf32>
    %158 = arith.divf %156, %157 : vector<2x512xf32>
    %159 = vector.extract_strided_slice %153 {offsets = [0, 256], sizes = [2, 96], strides = [1, 1]} : vector<2x512xf32> to vector<2x96xf32>
    %160 = math.tanh %159 : vector<2x96xf32>
    %161 = vector.extract_strided_slice %158 {offsets = [0, 128], sizes = [2, 96], strides = [1, 1]} : vector<2x512xf32> to vector<2x96xf32>
    %162 = arith.mulf %161, %147 : vector<2x96xf32>
    %163 = vector.extract_strided_slice %158 {offsets = [0, 0], sizes = [2, 96], strides = [1, 1]} : vector<2x512xf32> to vector<2x96xf32>
    %164 = arith.mulf %163, %160 : vector<2x96xf32>
    %165 = arith.addf %162, %164 : vector<2x96xf32>
    %166 = vector.extract_strided_slice %158 {offsets = [0, 384], sizes = [2, 96], strides = [1, 1]} : vector<2x512xf32> to vector<2x96xf32>
    %167 = math.tanh %165 : vector<2x96xf32>
    %168 = arith.mulf %166, %167 : vector<2x96xf32>
    %cst_24 = arith.constant dense<0.000000e+00> : vector<2x512xf32>
    %169 = tpu.matmul %168, %0, %cst_24 {dimension_numbers = #tpu.dot_dimension_numbers<[1], [0], [0], [1], [0, 0, 1, 1], [], []>} : vector<2x96xf32>, vector<96x512xf32>, vector<2x512xf32> -> vector<2x512xf32>
    %170 = arith.addf %169, %3 : vector<2x512xf32>
    %171 = arith.negf %170 : vector<2x512xf32>
    %172 = math.exp %171 : vector<2x512xf32>
    %cst_25 = arith.constant 1.000000e+00 : f32
    %173 = vector.broadcast %cst_25 : f32 to vector<2x512xf32>
    %174 = arith.addf %173, %172 : vector<2x512xf32>
    %175 = arith.divf %173, %174 : vector<2x512xf32>
    %176 = vector.extract_strided_slice %170 {offsets = [0, 256], sizes = [2, 96], strides = [1, 1]} : vector<2x512xf32> to vector<2x96xf32>
    %177 = math.tanh %176 : vector<2x96xf32>
    %178 = vector.extract_strided_slice %175 {offsets = [0, 128], sizes = [2, 96], strides = [1, 1]} : vector<2x512xf32> to vector<2x96xf32>
    %179 = arith.mulf %178, %165 : vector<2x96xf32>
    %180 = vector.extract_strided_slice %175 {offsets = [0, 0], sizes = [2, 96], strides = [1, 1]} : vector<2x512xf32> to vector<2x96xf32>
    %181 = arith.mulf %180, %177 : vector<2x96xf32>
    %182 = arith.addf %179, %181 : vector<2x96xf32>
    %183 = vector.extract_strided_slice %175 {offsets = [0, 384], sizes = [2, 96], strides = [1, 1]} : vector<2x512xf32> to vector<2x96xf32>
    %184 = math.tanh %182 : vector<2x96xf32>
    %185 = arith.mulf %183, %184 : vector<2x96xf32>
    %cst_26 = arith.constant dense<0.000000e+00> : vector<2x512xf32>
    %186 = tpu.matmul %185, %0, %cst_26 {dimension_numbers = #tpu.dot_dimension_numbers<[1], [0], [0], [1], [0, 0, 1, 1], [], []>} : vector<2x96xf32>, vector<96x512xf32>, vector<2x512xf32> -> vector<2x512xf32>
    %187 = arith.addf %186, %3 : vector<2x512xf32>
    %188 = arith.negf %187 : vector<2x512xf32>
    %189 = math.exp %188 : vector<2x512xf32>
    %cst_27 = arith.constant 1.000000e+00 : f32
    %190 = vector.broadcast %cst_27 : f32 to vector<2x512xf32>
    %191 = arith.addf %190, %189 : vector<2x512xf32>
    %192 = arith.divf %190, %191 : vector<2x512xf32>
    %193 = vector.extract_strided_slice %187 {offsets = [0, 256], sizes = [2, 96], strides = [1, 1]} : vector<2x512xf32> to vector<2x96xf32>
    %194 = math.tanh %193 : vector<2x96xf32>
    %195 = vector.extract_strided_slice %192 {offsets = [0, 128], sizes = [2, 96], strides = [1, 1]} : vector<2x512xf32> to vector<2x96xf32>
    %196 = arith.mulf %195, %182 : vector<2x96xf32>
    %197 = vector.extract_strided_slice %192 {offsets = [0, 0], sizes = [2, 96], strides = [1, 1]} : vector<2x512xf32> to vector<2x96xf32>
    %198 = arith.mulf %197, %194 : vector<2x96xf32>
    %199 = arith.addf %196, %198 : vector<2x96xf32>
    %200 = vector.extract_strided_slice %192 {offsets = [0, 384], sizes = [2, 96], strides = [1, 1]} : vector<2x512xf32> to vector<2x96xf32>
    %201 = math.tanh %199 : vector<2x96xf32>
    %202 = arith.mulf %200, %201 : vector<2x96xf32>
    %c0_28 = arith.constant 0 : index
    %c0_29 = arith.constant 0 : index
    %203 = vector.load %arg3[%c0_28, %c0_29] : memref<97x32xf32, #tpu.memory_space<vmem>>, vector<96x32xf32>
    %cst_30 = arith.constant dense<0.000000e+00> : vector<2x32xf32>
    %204 = tpu.matmul %202, %203, %cst_30 {dimension_numbers = #tpu.dot_dimension_numbers<[1], [0], [0], [1], [0, 0, 1, 1], [], []>} : vector<2x96xf32>, vector<96x32xf32>, vector<2x32xf32> -> vector<2x32xf32>
    %c96 = arith.constant 96 : index
    %c0_31 = arith.constant 0 : index
    %205 = vector.load %arg3[%c96, %c0_31] : memref<97x32xf32, #tpu.memory_space<vmem>>, vector<1x32xf32>
    %206 = vector.broadcast %205 : vector<1x32xf32> to vector<2x32xf32>
    %207 = arith.addf %204, %206 : vector<2x32xf32>
    %cst_32 = arith.constant 0.000000e+00 : f32
    %208 = vector.broadcast %cst_32 : f32 to vector<2x32xf32>
    %209 = arith.maximumf %207, %208 : vector<2x32xf32>
    %210 = arith.mulf %209, %209 : vector<2x32xf32>
    %cst_33 = arith.constant dense<0.000000e+00> : vector<2xf32>
    %211 = vector.multi_reduction <add>, %210, %cst_33 [1] : vector<2x32xf32> to vector<2xf32>
    %212 = vector.shape_cast %211 : vector<2xf32> to vector<2x1xf32>
    %213 = math.rsqrt %212 : vector<2x1xf32>
    %214 = vector.broadcast %213 : vector<2x1xf32> to vector<2x32xf32>
    %215 = arith.mulf %209, %214 : vector<2x32xf32>
    %c0_34 = arith.constant 0 : index
    %c0_35 = arith.constant 0 : index
    %216 = vector.load %arg4[%c0_34, %c0_35] : memref<2x32xf32, #tpu.memory_space<vmem>>, vector<2x32xf32>
    tpu.vector_store %arg4[%c0_34, %c0_35], %215 {strides = array<i32>} : memref<2x32xf32, #tpu.memory_space<vmem>>, vector<2x32xf32>,
    return
  }
}

</mosaic_0001>

<bundles_post_ra>
// kernel: speaker_encoder_forward.1
= control target key start
LH: loop header
LB: loop body
LE: loop exit
PB: predicated region body
PF: predicated region fallthrough
CT: control target
= control target key end

     0   :  { %9 = vsyncpa [#allocation3], 0  ;;  %s3144_s0 = inlined_call_operand.vmem [shape: f32[16,32], index: 0, kind: input, shape index: {}]   ;;  %s3145_s1 = inlined_call_operand.hbm [shape: f32[96,512], index: 1, kind: input, shape index: {}]   ;;  %s3146_s2 = inlined_call_operand.hbm [shape: f32[33,512], index: 2, kind: input, shape index: {}]   ;;  %s3147_s3 = inlined_call_operand.vmem [shape: f32[97,32], index: 3, kind: input, shape index: {}]   ;;  %s3148_s4 = inlined_call_operand.hbm [shape: f32[2,32], index: 4, kind: output, shape index: {}]  }
   0x1   :  { %10 = vsyncpa [#allocation6], 0 }
   0x2   :  { %11 = vsyncpa [#allocation4], 0  ;;  %s18_s17 = sshll.u32 %s3145_s1, 4  ;;  %s2240_s18 = smov [#allocation2]   ;;  %s19_s17 = int_to_ptr.hbm [resolvable:$true] %s18_s17 }
   0x3   :  { %s20_s19 = sshll.u32 %s2240_s18, 4  ;;  %s31_s22 = sshll.u32 %s3146_s2, 4  ;;  %s21_s19 = int_to_ptr.vmem [resolvable:$true] %s20_s19  ;;  %s32_s22 = int_to_ptr.hbm [resolvable:$true] %s31_s22 }
   0x4   :  { %s2241_s23 = smov 512   ;;  %s2242_s24 = smov 32  }
   0x5   :  { %26 = dma.hbm_to_vmem [thread:$0]  %s19_s17, 6144, %s21_s19, [#allocation3], %s2241_s23, %s2241_s23, %s2242_s24  }
   0x6   :  { %s2243_s25 = smov [#allocation5]  }
   0x7   :  { %s33_s26 = sshll.u32 %s2243_s25, 4  ;;  %s34_s26 = int_to_ptr.vmem [resolvable:$true] %s33_s26 }
   0x8   :  { %39 = dma.hbm_to_vmem [thread:$0]  %s32_s22, 2560, %s34_s26, [#allocation6], %s2241_s23, %s2241_s23, %s2242_s24  }
   0x9   :  { %2234 = dma.done.wait [#allocation3], 6144  }
   0xa   :  { %2235 = vsyncadd [#allocation3], 4294961152 }
   0xb   :  { %2236 = dma.done.wait [#allocation6], 2560  }
   0xc   :  { %2237 = vsyncadd [#allocation6], 4294964736  ;;  %v123_v0 = vld [vmem:[#allocation5 + $0x60] sm:$0xff]  ;;  %v126_v1 = vld [vmem:[#allocation5 + $0x78] sm:$0xff]  ;;  %vm127_vm0 = vcmask 261120   ;;  %v3149_v49 = vmov 0.0  }
   0xd   :  { %v2277_v2 = vld [vmem:[#allocation2 + $0x160] sm:$0xff]  ;;  %146 = vmatpush.msra.mxu1 %v123_v0  ;;  %215 = vmatpush.msra.mxu3 %v126_v1  ;;  %v122_v4 = vld [vmem:[#allocation5 + $0x58] sm:$0xff]  ;;  %v125_v13 = vld [vmem:[#allocation5 + $0x70] sm:$0xff]  ;;  %vm234_vm14 = vcmask 785408   ;;  %s2245_s2 = smov [#allocation7]  }
   0xe   :  { %v119_v3 = vld [vmem:[#allocation5 + $0x40] sm:$0xff]  ;;  %242 = vmatpush.msra.mxu0 %v2277_v2  ;;  %v118_v7 = vld [vmem:[#allocation5 + $0x38] sm:$0xff]  ;;  %v124_v14 = vld [vmem:[#allocation5 + $0x68] sm:$0xff]  ;;  %192 = vmatpush.msra.mxu2 %v125_v13 }
   0xf   :  { %v2279_v5 = vld [vmem:[#allocation2 + $0x140] sm:$0xff]  ;;  %147 = vmatpush.msra.mxu1 %v119_v3  ;;  %216 = vmatpush.msra.mxu3 %v122_v4  ;;  %v114_v10 = vld [vmem:[#allocation5 + $0x18] sm:$0xff]  ;;  %v121_v17 = vld [vmem:[#allocation5 + $0x50] sm:$0xff] }
  0x10   :  { %v115_v6 = vld [vmem:[#allocation5 + $0x20] sm:$0xff]  ;;  %243 = vmatpush.msra.mxu0 %v2279_v5  ;;  %v2293_v15 = vld [vmem:[#allocation2 + $0x178] sm:$0xff]  ;;  %v120_v19 = vld [vmem:[#allocation5 + $0x48] sm:$0xff]  ;;  %193 = vmatpush.msra.mxu2 %v121_v17 }
  0x11   :  { %v2282_v8 = vld [vmem:[#allocation2 + $0x120] sm:$0xff]  ;;  %148 = vmatpush.msra.mxu1 %v115_v6  ;;  %217 = vmatpush.msra.mxu3 %v118_v7  ;;  %v2300_v18 = vld [vmem:[#allocation2 + $0x158] sm:$0xff]  ;;  %v117_v21 = vld [vmem:[#allocation5 + $0x30] sm:$0xff] }
  0x12   :  { %v111_v9 = vld [vmem:[#allocation5] sm:$0xff]  ;;  %244 = vmatpush.msra.mxu0 %v2282_v8  ;;  %v2306_v22 = vld [vmem:[#allocation2 + $0x138] sm:$0xff]  ;;  %v116_v23 = vld [vmem:[#allocation5 + $0x28] sm:$0xff]  ;;  %194 = vmatpush.msra.mxu2 %v117_v21 }
  0x13   :  { %v2285_v11 = vld [vmem:[#allocation2 + $0x100] sm:$0xff]  ;;  %149 = vmatpush.msra.mxu1 %v111_v9  ;;  %218 = vmatpush.msra.mxu3 %v114_v10  ;;  %v113_v25 = vld [vmem:[#allocation5 + $0x10] sm:$0xff]  ;;  %v2312_v26 = vld [vmem:[#allocation2 + $0x118] sm:$0xff] }
  0x14   :  { %v2290_v12 = vld [vmem:[%s3144_s0] sm:$0xff]  ;;  %245 = vmatpush.msra.mxu0 %v2285_v11  ;;  %v112_v27 = vld [vmem:[#allocation5 + $0x8] sm:$0xff]  ;;  %195 = vmatpush.msra.mxu2 %v113_v25  ;;  %v2323_v30 = vld [vmem:[#allocation2 + $0x170] sm:$0xff] }
  0x15   :  { %v2295_v16 = vld [vmem:[#allocation2 + $0xe0] sm:$0xff]  ;;  %1828 = vmatmul.msk.f32.vlgmr.msra.gmra.mxu1 %vm127_vm0, %v2290_v12  ;;  %302 = vmatpush.msrb.mxu3 %v2293_v15  ;;  %v2321_v29 = vld [vmem:[%s3144_s0 + $0x8] sm:$0xff]  ;;  %v2326_v31 = vld [vmem:[#allocation2 + $0xf8] sm:$0xff]  ;;  %s1817_s0 = sshll.u32 %s3148_s4, 4  ;;  %s1818_s0 = int_to_ptr.hbm [resolvable:$true] %s1817_s0 }
  0x16   :  { %169 = vmatpush.msrb.mxu1 %v124_v14  ;;  %v2303_v20 = vld [vmem:[#allocation2 + $0xc0] sm:$0xff]  ;;  %246 = vmatpush.msra.mxu0 %v2295_v16  ;;  %v2333_v33 = vld [vmem:[#allocation2 + $0x168] sm:$0xff]  ;;  %v2335_v34 = vld [vmem:[#allocation2 + $0x150] sm:$0xff] }
  0x17   :  { %303 = vmatpush.msrb.mxu3 %v2300_v18  ;;  %v2309_v24 = vld [vmem:[#allocation2 + $0xa0] sm:$0xff]  ;;  %282 = vmatpush.msrb.mxu2 %v2323_v30  ;;  %v2340_v35 = vld [vmem:[#allocation2 + $0xd8] sm:$0xff]  ;;  %v2346_v37 = vld [vmem:[#allocation2 + $0x148] sm:$0xff] }
  0x18   :  { %170 = vmatpush.msrb.mxu1 %v120_v19  ;;  %247 = vmatpush.msra.mxu0 %v2303_v20  ;;  %v2315_v28 = vld [vmem:[#allocation2 + $0x80] sm:$0xff]  ;;  %v2348_v38 = vld [vmem:[#allocation2 + $0x130] sm:$0xff]  ;;  %v2352_v39 = vld [vmem:[#allocation2 + $0xb8] sm:$0xff] }
  0x19   :  { %304 = vmatpush.msrb.mxu3 %v2306_v22  ;;  %v2328_v32 = vld [vmem:[#allocation2 + $0x60] sm:$0xff]  ;;  %283 = vmatpush.msrb.mxu2 %v2335_v34  ;;  %v2358_v41 = vld [vmem:[#allocation2 + $0x128] sm:$0xff]  ;;  %v2360_v42 = vld [vmem:[#allocation2 + $0x110] sm:$0xff] }
  0x1a   :  { %171 = vmatpush.msrb.mxu1 %v116_v23  ;;  %248 = vmatpush.msra.mxu0 %v2309_v24  ;;  %v2342_v36 = vld [vmem:[#allocation2 + $0x40] sm:$0xff]  ;;  %v2364_v43 = vld [vmem:[#allocation2 + $0x98] sm:$0xff]  ;;  %v2372_v45 = vld [vmem:[#allocation2 + $0x108] sm:$0xff] }
  0x1b   :  { %305 = vmatpush.msrb.mxu3 %v2312_v26  ;;  %v2354_v40 = vld [vmem:[#allocation2 + $0x20] sm:$0xff]  ;;  %284 = vmatpush.msrb.mxu2 %v2348_v38  ;;  %v2377_v46 = vld [vmem:[#allocation2 + $0xf0] sm:$0xff]  ;;  %v2382_v47 = vld [vmem:[#allocation2 + $0x78] sm:$0xff] }
  0x1c   :  { %172 = vmatpush.msrb.mxu1 %v112_v27  ;;  %1834 = vmatmul.msk.f32.vlgmr.msra.gmra.mxu3 %vm127_vm0, %v2290_v12  ;;  %3217 = vst [vmem:[#allocation11_spill] sm:$0xff] %v2354_v40  ;;  %v2368_v44 = vld [vmem:[#allocation2] sm:$0xff]  ;;  %v2384_v48 = vld [vmem:[#allocation2 + $0xe8] sm:$0xff]  ;;  %v2388_v50 = vld [vmem:[#allocation2 + $0xd0] sm:$0xff] }
  0x1d   :  { %249 = vmatpush.msra.mxu0 %v2315_v28  ;;  %1829 = vmatmul.msk.f32.gmra.mxu1 %vm127_vm0, %v2321_v29  ;;  %3218 = vst [vmem:[#allocation12_spill] sm:$0xff] %v2368_v44  ;;  %v2393_v51 = vld [vmem:[#allocation2 + $0x58] sm:$0xff]  ;;  %v2395_v52 = vld [vmem:[#allocation2 + $0xc8] sm:$0xff]  ;;  %v2399_v53 = vld [vmem:[#allocation2 + $0xb0] sm:$0xff] }
  0x1e   :  { %306 = vmatpush.msrb.mxu3 %v2326_v31  ;;  %262 = vmatpush.msra.mxu1 %v2333_v33  ;;  %3219 = vst [vmem:[#allocation13_spill] sm:$0xff] %v2393_v51  ;;  %v2402_v54 = vld [vmem:[#allocation2 + $0x38] sm:$0xff]  ;;  %v2404_v55 = vld [vmem:[#allocation2 + $0xa8] sm:$0xff]  ;;  %v2409_v56 = vld [vmem:[#allocation2 + $0x90] sm:$0xff] }
  0x1f   :  { %250 = vmatpush.msra.mxu0 %v2328_v32  ;;  %285 = vmatpush.msrb.mxu2 %v2360_v42  ;;  %3220 = vst [vmem:[#allocation14_spill] sm:$0xff] %v2402_v54  ;;  %v2412_v57 = vld [vmem:[#allocation2 + $0x18] sm:$0xff]  ;;  %v2417_v58 = vld [vmem:[#allocation2 + $0x88] sm:$0xff]  ;;  %v2420_v59 = vld [vmem:[#allocation2 + $0x70] sm:$0xff] }
  0x20   :  { %307 = vmatpush.msrb.mxu3 %v2340_v35  ;;  %263 = vmatpush.msra.mxu1 %v2346_v37  ;;  %3221 = vst [vmem:[#allocation15_spill] sm:$0xff] %v2412_v57  ;;  %v2426_v60 = vld [vmem:[#allocation2 + $0x68] sm:$0xff]  ;;  %v2430_v61 = vld [vmem:[#allocation2 + $0x50] sm:$0xff] }
  0x21   :  { %251 = vmatpush.msra.mxu0 %v2342_v36  ;;  %1832 = vmatmul.msk.f32.vlgmr.msra.gmra.mxu2 %vm127_vm0, %v2290_v12  ;;  %3222 = vst [vmem:[#allocation16_spill] sm:$0xff] %v2430_v61  ;;  %v2435_v62 = vld [vmem:[#allocation2 + $0x48] sm:$0xff]  ;;  %v2438_v63 = vld [vmem:[#allocation2 + $0x30] sm:$0xff] }
  0x22   :  { %308 = vmatpush.msrb.mxu3 %v2352_v39  ;;  %264 = vmatpush.msra.mxu1 %v2358_v41  ;;  %3223 = vst [vmem:[#allocation17_spill] sm:$0xff] %v2435_v62  ;;  %v2442_v0 = vld [vmem:[#allocation2 + $0x28] sm:$0xff]  ;;  %v2446_v1 = vld [vmem:[#allocation2 + $0x10] sm:$0xff] }
  0x23   :  { %252 = vmatpush.msra.mxu0 %v2354_v40  ;;  %286 = vmatpush.msrb.mxu2 %v2377_v46  ;;  %3224 = vst [vmem:[#allocation18_spill] sm:$0xff] %v2438_v63  ;;  %v2450_v3 = vld [vmem:[#allocation2 + $0x8] sm:$0xff] }
  0x24   :  { %309 = vmatpush.msrb.mxu3 %v2364_v43  ;;  %265 = vmatpush.msra.mxu1 %v2372_v45  ;;  %3225 = vst [vmem:[#allocation19_spill] sm:$0xff] %v2442_v0  ;;  %v99_v7 = vld [vmem:[#allocation5 + $0x80] ss:$8 sm:$0xf] }
  0x25   :  { %1835 = vmatmul.msk.f32.gmra.mxu3 %vm127_vm0, %v2321_v29  ;;  %253 = vmatpush.msra.mxu0 %v2368_v44  ;;  %3226 = vst [vmem:[#allocation20_spill] sm:$0xff] %v2446_v1  ;;  %v2549_v9 = vperm.slane %v99_v7, 0  ;;  %v2557_v23 = vperm.slane %v99_v7, 3 }
  0x26   :  { %254 = vmatmul.f32.vlgmr.msra.gmra.mxu0 %v3149_v49  ;;  %1830 = vmatmul.msk.f32.vlgmr.msrb.gmra.mxu1 %vm127_vm0, %v2290_v12  ;;  %3227 = vst [vmem:[#allocation21_spill] sm:$0xff] %v2450_v3 }
  0x27   :  { %310 = vmatpush.msrb.mxu3 %v2382_v47  ;;  %266 = vmatpush.msra.mxu1 %v2384_v48  ;;  %3229 = vst [vmem:[#allocation23_spill] sm:$0xff] %v2549_v9 }
  0x28   :  { %287 = vmatpush.msrb.mxu2 %v2388_v50  ;;  %402 = vmatpush.msrb.mxu0 %v2277_v2  ;;  %3232 = vst [vmem:[#allocation26_spill] sm:$0xff] %v2557_v23 }
  0x29   :  { %311 = vmatpush.msrb.mxu3 %v2393_v51  ;;  %267 = vmatpush.msra.mxu1 %v2395_v52 }
  0x2a   :  { %288 = vmatpush.msrb.mxu2 %v2399_v53  ;;  %403 = vmatpush.msrb.mxu0 %v2279_v5 }
  0x2b   :  { %312 = vmatpush.msrb.mxu3 %v2402_v54  ;;  %268 = vmatpush.msra.mxu1 %v2404_v55 }
  0x2c   :  { %289 = vmatpush.msrb.mxu2 %v2409_v56  ;;  %404 = vmatpush.msrb.mxu0 %v2282_v8 }
  0x2d   :  { %313 = vmatpush.msrb.mxu3 %v2412_v57  ;;  %1833 = vmatmul.msk.f32.gmra.mxu2 %vm127_vm0, %v2321_v29 }
  0x2e   :  { %269 = vmatpush.msra.mxu1 %v2417_v58  ;;  %314 = vmatmul.f32.vlgmr.msrb.gmra.mxu3 %v3149_v49 }
  0x2f   :  { %1831 = vmatmul.msk.f32.gmra.mxu1 %vm127_vm0, %v2321_v29  ;;  %290 = vmatpush.msrb.mxu2 %v2420_v59 }
  0x30   :  { %270 = vmatpush.msra.mxu1 %v2426_v60  ;;  %462 = vmatpush.msra.mxu3 %v2293_v15 }
  0x31   :  { %291 = vmatpush.msrb.mxu2 %v2430_v61  ;;  %405 = vmatpush.msrb.mxu0 %v2285_v11 }
  0x32   :  { %271 = vmatpush.msra.mxu1 %v2435_v62  ;;  %463 = vmatpush.msra.mxu3 %v2300_v18 }
  0x33   :  { %292 = vmatpush.msrb.mxu2 %v2438_v63  ;;  %406 = vmatpush.msrb.mxu0 %v2295_v16 }
  0x34   :  { %272 = vmatpush.msra.mxu1 %v2442_v0  ;;  %464 = vmatpush.msra.mxu3 %v2306_v22 }
  0x35   :  { %293 = vmatpush.msrb.mxu2 %v2446_v1  ;;  %407 = vmatpush.msrb.mxu0 %v2303_v20 }
  0x36   :  { %273 = vmatpush.msra.mxu1 %v2450_v3  ;;  %294 = vmatmul.f32.vlgmr.msrb.gmra.mxu2 %v3149_v49 }
  0x37   :  { %274 = vmatmul.f32.vlgmr.msra.gmra.mxu1 %v3149_v49  ;;  %442 = vmatpush.msra.mxu2 %v2323_v30  ;;  %v2564_v49 = vperm.slane %v99_v7, 1 }
  0x38   :  { %422 = vmatpush.msrb.mxu1 %v2333_v33  ;;  %465 = vmatpush.msra.mxu3 %v2312_v26 }
  0x39   :  { %443 = vmatpush.msra.mxu2 %v2335_v34  ;;  %408 = vmatpush.msrb.mxu0 %v2309_v24  ;;  %3235 = vst [vmem:[#allocation29_spill] sm:$0xff] %v2564_v49 }
  0x3a   :  { %423 = vmatpush.msrb.mxu1 %v2346_v37  ;;  %466 = vmatpush.msra.mxu3 %v2326_v31 }
  0x3b   :  { %444 = vmatpush.msra.mxu2 %v2348_v38  ;;  %409 = vmatpush.msrb.mxu0 %v2315_v28 }
  0x3c   :  { %424 = vmatpush.msrb.mxu1 %v2358_v41  ;;  %467 = vmatpush.msra.mxu3 %v2340_v35 }
  0x3d   :  { %445 = vmatpush.msra.mxu2 %v2360_v42  ;;  %410 = vmatpush.msrb.mxu0 %v2328_v32 }
  0x3e   :  { %425 = vmatpush.msrb.mxu1 %v2372_v45  ;;  %468 = vmatpush.msra.mxu3 %v2352_v39 }
  0x3f   :  { %446 = vmatpush.msra.mxu2 %v2377_v46  ;;  %411 = vmatpush.msrb.mxu0 %v2342_v36 }
  0x40   :  { %426 = vmatpush.msrb.mxu1 %v2384_v48  ;;  %469 = vmatpush.msra.mxu3 %v2364_v43 }
  0x41   :  { %447 = vmatpush.msra.mxu2 %v2388_v50  ;;  %412 = vmatpush.msrb.mxu0 %v2354_v40 }
  0x42   :  { %427 = vmatpush.msrb.mxu1 %v2395_v52  ;;  %470 = vmatpush.msra.mxu3 %v2382_v47 }
  0x43   :  { %448 = vmatpush.msra.mxu2 %v2399_v53  ;;  %413 = vmatpush.msrb.mxu0 %v2368_v44 }
  0x44   :  { %428 = vmatpush.msrb.mxu1 %v2404_v55  ;;  %471 = vmatpush.msra.mxu3 %v2393_v51 }
  0x45   :  { %449 = vmatpush.msra.mxu2 %v2409_v56  ;;  %558 = vmatpush.msra.mxu0 %v2277_v2 }
  0x46   :  { %429 = vmatpush.msrb.mxu1 %v2417_v58  ;;  %472 = vmatpush.msra.mxu3 %v2402_v54 }
  0x47   :  { %450 = vmatpush.msra.mxu2 %v2420_v59  ;;  %559 = vmatpush.msra.mxu0 %v2279_v5 }
  0x48   :  { %430 = vmatpush.msrb.mxu1 %v2426_v60  ;;  %473 = vmatpush.msra.mxu3 %v2412_v57 }
  0x49   :  { %451 = vmatpush.msra.mxu2 %v2430_v61  ;;  %560 = vmatpush.msra.mxu0 %v2282_v8 }
  0x4a   :  { %618 = vmatpush.msrb.mxu3 %v2293_v15  ;;  %431 = vmatpush.msrb.mxu1 %v2435_v62 }
  0x4b   :  { %452 = vmatpush.msra.mxu2 %v2438_v63  ;;  %561 = vmatpush.msra.mxu0 %v2285_v11 }
  0x4c   :  { %619 = vmatpush.msrb.mxu3 %v2300_v18  ;;  %432 = vmatpush.msrb.mxu1 %v2442_v0 }
  0x4d   :  { %453 = vmatpush.msra.mxu2 %v2446_v1  ;;  %562 = vmatpush.msra.mxu0 %v2295_v16 }
  0x4e   :  { %620 = vmatpush.msrb.mxu3 %v2306_v22  ;;  %433 = vmatpush.msrb.mxu1 %v2450_v3 }
  0x4f   :  { %598 = vmatpush.msrb.mxu2 %v2323_v30  ;;  %563 = vmatpush.msra.mxu0 %v2303_v20 }
  0x50   :  { %578 = vmatpush.msra.mxu1 %v2333_v33  ;;  %621 = vmatpush.msrb.mxu3 %v2312_v26 }
  0x51   :  { %599 = vmatpush.msrb.mxu2 %v2335_v34  ;;  %564 = vmatpush.msra.mxu0 %v2309_v24 }
  0x52   :  { %579 = vmatpush.msra.mxu1 %v2346_v37  ;;  %622 = vmatpush.msrb.mxu3 %v2326_v31 }
  0x53   :  { %600 = vmatpush.msrb.mxu2 %v2348_v38  ;;  %565 = vmatpush.msra.mxu0 %v2315_v28 }
  0x54   :  { %580 = vmatpush.msra.mxu1 %v2358_v41  ;;  %623 = vmatpush.msrb.mxu3 %v2340_v35 }
  0x55   :  { %601 = vmatpush.msrb.mxu2 %v2360_v42  ;;  %566 = vmatpush.msra.mxu0 %v2328_v32 }
  0x56   :  { %581 = vmatpush.msra.mxu1 %v2372_v45  ;;  %624 = vmatpush.msrb.mxu3 %v2352_v39 }
  0x57   :  { %602 = vmatpush.msrb.mxu2 %v2377_v46  ;;  %567 = vmatpush.msra.mxu0 %v2342_v36 }
  0x58   :  { %582 = vmatpush.msra.mxu1 %v2384_v48  ;;  %625 = vmatpush.msrb.mxu3 %v2364_v43 }
  0x59   :  { %603 = vmatpush.msrb.mxu2 %v2388_v50  ;;  %568 = vmatpush.msra.mxu0 %v2354_v40 }
  0x5a   :  { %583 = vmatpush.msra.mxu1 %v2395_v52  ;;  %626 = vmatpush.msrb.mxu3 %v2382_v47 }
  0x5b   :  { %604 = vmatpush.msrb.mxu2 %v2399_v53  ;;  %569 = vmatpush.msra.mxu0 %v2368_v44 }
  0x5c   :  { %584 = vmatpush.msra.mxu1 %v2404_v55  ;;  %627 = vmatpush.msrb.mxu3 %v2393_v51 }
  0x5d   :  { %605 = vmatpush.msrb.mxu2 %v2409_v56 }
  0x5e   :  { %585 = vmatpush.msra.mxu1 %v2417_v58  ;;  %628 = vmatpush.msrb.mxu3 %v2402_v54 }
  0x5f   :  { %606 = vmatpush.msrb.mxu2 %v2420_v59 }
  0x60   :  { %586 = vmatpush.msra.mxu1 %v2426_v60  ;;  %629 = vmatpush.msrb.mxu3 %v2412_v57 }
  0x61   :  { %607 = vmatpush.msrb.mxu2 %v2430_v61 }
  0x62   :  { %587 = vmatpush.msra.mxu1 %v2435_v62 }
  0x63   :  { %608 = vmatpush.msrb.mxu2 %v2438_v63 }
  0x64   :  { %588 = vmatpush.msra.mxu1 %v2442_v0 }
  0x65   :  { %609 = vmatpush.msrb.mxu2 %v2446_v1 }
  0x66   :  { %589 = vmatpush.msra.mxu1 %v2450_v3  ;;  %v2573_v3 = vperm.slane %v99_v7, 2 }
  0x68   :  { %3238 = vst [vmem:[#allocation32_spill] sm:$0xff] %v2573_v3 }
  0x92   :  { %v151_v4 = vpop.f32.mrf.mxu1 }
  0x93   :  { %v2552_v12 = vadd.f32 %v151_v4, %v2549_v9 }
  0x95   :  { %3230 = vst [vmem:[#allocation24_spill] sm:$0xff] %v2552_v12 }
  0x9a   :  { %v2547_v6 = vpop.f32.mrf.mxu1 }
  0x9b   :  { %3228 = vst [vmem:[#allocation22_spill] sm:$0xff] %v2547_v6 }
  0x9f   :  { %v220_v10 = vpop.f32.mrf.mxu3 }
  0xa0   :  { %v2562_v29 = vadd.f32 %v220_v10, %v2557_v23 }
  0xa2   :  { %3234 = vst [vmem:[#allocation28_spill] sm:$0xff] %v2562_v29 }
  0xa3   :  { %v255_v13 = vpop.f32.mrf.mxu0  ;;  %v174_v14 = vpop.f32.mrf.mxu1 }
  0xa4   :  { %v256_v17 = vadd.f32 %v255_v13, %v2552_v12  ;;  %v197_v4 = vpop.f32.mrf.mxu2  ;;  %v2568_v13 = vadd.f32 %v174_v14, %v2564_v49  ;;  %v226_v49 = vlaneseq }
  0xa6   :  { %v1838_v19 = vmul.f32 -1.442695, %v256_v17  ;;  %3236 = vst [vmem:[#allocation30_spill] sm:$0xff] %v2568_v13 }
  0xa8   :  { %1912 = vpow2.f32 %v1838_v19  ;;  %v2555_v21 = vpop.f32.mrf.mxu3 }
  0xa9   :  { %3231 = vst [vmem:[#allocation25_spill] sm:$0xff] %v2555_v21 }
  0xac   :  { %v2559_v25 = vpop.f32.mrf.mxu1 }
  0xad   :  { %3233 = vst [vmem:[#allocation27_spill] sm:$0xff] %v2559_v25 }
  0xae   :  { %v1913_v27 = vpop.eup %1912 }
  0xaf   :  { %v327_v6 = vadd.f32 1.0, %v1913_v27 }
  0xb0   :  { %v2571_v12 = vpop.f32.mrf.mxu2 }
  0xb1   :  { %v315_v9 = vpop.f32.mrf.mxu3  ;;  %1914 = vrcp.f32 %v327_v6  ;;  %3237 = vst [vmem:[#allocation31_spill] sm:$0xff] %v2571_v12  ;;  %vm335_vm2 = vweird.f32 %v327_v6 }
  0xb2   :  { %v316_v57 = vadd.f32 %v315_v9, %v2562_v29 }
  0xb4   :  { %v1840_v17 = vmul.f32 -1.442695, %v316_v57  ;;  %v275_v19 = vpop.f32.mrf.mxu1  ;;  %v2576_v57 = vadd.f32 %v197_v4, %v2573_v3  ;;  %v2579_v4 = vand.u32 127, %v226_v49 }
  0xb5   :  { %v276_v21 = vadd.f32 %v275_v19, %v2568_v13 }
  0xb6   :  { %1916 = vpow2.f32 %v1840_v17  ;;  %3239 = vst [vmem:[#allocation33_spill] sm:$0xff] %v2576_v57  ;;  %vm228_vm9 = vcmp.lt.s32.totalorder %v2579_v4, 32 }
  0xb7   :  { %v1839_v25 = vmul.f32 -1.442695, %v276_v21  ;;  %v1915_v10 = vpop.eup %1914 }
  0xb8   :  { %v331_v1 = vmul.f32 %v1915_v10, %v327_v6  ;;  %vm336_vm1 = vweird.f32 %v1915_v10 }
  0xb9   :  { %1918 = vpow2.f32 %v1839_v25  ;;  %v295_v19 = vpop.f32.mrf.mxu2  ;;  %vm337_vm3 = vmor %vm335_vm2, %vm336_vm1 }
  0xba   :  { %v332_v14 = vsub.f32 1.0, %v331_v1  ;;  %v296_v21 = vadd.f32 %v295_v19, %v2576_v57  ;;  %v339_v1 = vand.u32 2147483647, %v327_v6 }
  0xbc   :  { %v1917_v23 = vpop.eup %1916  ;;  %v333_v17 = vmul.f32 %v1915_v10, %v332_v14  ;;  %vm340_vm6 = vcmp.eq.f32.partialorder %v339_v1, 8.507059e+37  ;;  %v3245_v1 = vld [vmem:[#allocation18_spill] sm:$0xff] }
  0xbd   :  { %v329_v27 = vadd.f32 1.0, %v1917_v23  ;;  %v341_v23 = vand.u32 2147483648, %v327_v6 }
  0xbe   :  { %v334_v44 = vadd.f32 %v1915_v10, %v333_v17 }
  0xbf   :  { %v1919_v9 = vpop.eup %1918  ;;  %1920 = vrcp.f32 %v329_v27  ;;  %v342_v63 = vor.u32 1.1754944e-38, %v341_v23  ;;  %vm365_vm11 = vweird.f32 %v329_v27 }
  0xc0   :  { %v328_v29 = vadd.f32 1.0, %v1919_v9  ;;  %v338_v14 = vsel %vm337_vm3, %v1915_v10, %v334_v44  ;;  %v3240_v44 = vmov 0.0  }
  0xc1   :  { %v343_v51 = vsel %vm340_vm6, %v342_v63, %v338_v14  ;;  %v1836_v10 = vsel %vm228_vm9, 1.0, %v3240_v44  ;;  %v3246_v14 = vld [vmem:[#allocation14_spill] sm:$0xff] }
  0xc2   :  { %1922 = vrcp.f32 %v328_v29  ;;  %v356_v54 = vand.u32 2147483648, %v328_v29  ;;  %v354_v19 = vand.u32 2147483647, %v328_v29  ;;  %vm350_vm5 = vweird.f32 %v328_v29 }
  0xc3   :  { %1924 = vtanh.f32 %v296_v21 }
  0xc4   :  { %v357_v40 = vor.u32 1.1754944e-38, %v356_v54  ;;  %vm355_vm8 = vcmp.eq.f32.partialorder %v354_v19, 8.507059e+37  ;;  %v369_v54 = vand.u32 2147483647, %v329_v27  ;;  %v3247_v19 = vld [vmem:[#allocation12_spill] sm:$0xff] }
  0xc5   :  { %v1921_v12 = vpop.eup %1920 }
  0xc6   :  { %v361_v7 = vmul.f32 %v1921_v12, %v329_v27  ;;  %vm366_vm10 = vweird.f32 %v1921_v12  ;;  %vm370_vm13 = vcmp.eq.f32.partialorder %v369_v54, 8.507059e+37 }
  0xc7   :  { %vm367_vm12 = vmor %vm365_vm11, %vm366_vm10 }
  0xc8   :  { %v1923_v25 = vpop.eup %1922  ;;  %v362_v57 = vsub.f32 1.0, %v361_v7 }
  0xc9   :  { %v346_v13 = vmul.f32 %v1923_v25, %v328_v29  ;;  %vm351_vm4 = vweird.f32 %v1923_v25  ;;  %v1925_v0 = vpop.eup %1924  ;;  %v371_v29 = vand.u32 2147483648, %v329_v27  ;;  %v3244_v27 = vld [vmem:[#allocation19_spill] sm:$0xff] }
  0xca   :  { %vm352_vm7 = vmor %vm350_vm5, %vm351_vm4  ;;  %v363_v6 = vmul.f32 %v1921_v12, %v362_v57  ;;  %vm231_vm4 = vcmp.lt.s32.totalorder %v2579_v4, 64 }
  0xcb   :  { %v347_v9 = vsub.f32 1.0, %v346_v13 }
  0xcc   :  { %v364_v7 = vadd.f32 %v1921_v12, %v363_v6  ;;  %v3250_v6 = vld [vmem:[#allocation15_spill] sm:$0xff] }
  0xcd   :  { %v348_v3 = vmul.f32 %v1923_v25, %v347_v9  ;;  %v377_v9 = vmul.f32 %v1925_v0, %v343_v51  ;;  %v3242_v0 = vld [vmem:[#allocation13_spill] sm:$0xff] }
  0xce   :  { %v368_v63 = vsel %vm367_vm12, %v1921_v12, %v364_v7  ;;  %v3243_v12 = vld [vmem:[#allocation11_spill] sm:$0xff] }
  0xcf   :  { %v349_v17 = vadd.f32 %v1923_v25, %v348_v3 }
  0xd1   :  { %v353_v13 = vsel %vm352_vm7, %v1923_v25, %v349_v17  ;;  %v372_v25 = vor.u32 1.1754944e-38, %v371_v29  ;;  %v3248_v17 = vld [vmem:[#allocation21_spill] sm:$0xff] }
  0xd2   :  { %v358_v49 = vsel %vm355_vm8, %v357_v40, %v353_v13  ;;  %v3249_v13 = vld [vmem:[#allocation20_spill] sm:$0xff] }
  0xd3   :  { %v376_v21 = vmul.f32 0.0, %v358_v49  ;;  %v373_v57 = vsel %vm370_vm13, %v372_v25, %v368_v63  ;;  %v3251_v49 = vld [vmem:[#allocation24_spill] sm:$0xff] }
  0xd5   :  { %v378_v61 = vadd.f32 %v377_v9, %v376_v21  ;;  %v387_v21 = vrot.slane %v3251_v49, 2  ;;  %v3252_v9 = vld [vmem:[#allocation30_spill] sm:$0xff] }
  0xd7   :  { %1926 = vtanh.f32 %v378_v61  ;;  %v2583_v3 = vmul.f32 %v1836_v10, %v378_v61  ;;  %v3241_v61 = vld [vmem:[#allocation16_spill] sm:$0xff] }
  0xdd   :  { %v1927_v23 = vpop.eup %1926 }
  0xde   :  { %v380_v40 = vmul.f32 %v1927_v23, %v373_v57  ;;  %v3253_v57 = vld [vmem:[#allocation28_spill] sm:$0xff] }
  0xe0   :  { %v381_v51 = vmul.f32 %v1836_v10, %v380_v40  ;;  %v388_v10 = vrot.slane %v3252_v9, 2  ;;  %v390_v40 = vrot.slane %v3253_v57, 2 }
  0xe2   :  { %1841 = vmatmul.msk.f32.vlgmr.msrb.gmra.mxu0 %vm234_vm14, %v381_v51  ;;  %1842 = vmatmul.msk.f32.vlgmr.msrb.gmra.mxu1 %vm234_vm14, %v381_v51 }
  0xe3   :  { %1843 = vmatmul.msk.f32.vlgmr.msra.gmra.mxu2 %vm234_vm14, %v381_v51  ;;  %1844 = vmatmul.msk.f32.vlgmr.msra.gmra.mxu3 %vm234_vm14, %v381_v51 }
  0xe4   :  { %712 = vmatpush.msrb.mxu0 %v2277_v2  ;;  %732 = vmatpush.msrb.mxu1 %v2333_v33 }
  0xe5   :  { %752 = vmatpush.msra.mxu2 %v2323_v30  ;;  %772 = vmatpush.msra.mxu3 %v2293_v15 }
  0xe6   :  { %713 = vmatpush.msrb.mxu0 %v2279_v5  ;;  %733 = vmatpush.msrb.mxu1 %v2346_v37 }
  0xe7   :  { %753 = vmatpush.msra.mxu2 %v2335_v34  ;;  %773 = vmatpush.msra.mxu3 %v2300_v18 }
  0xe8   :  { %714 = vmatpush.msrb.mxu0 %v2282_v8  ;;  %734 = vmatpush.msrb.mxu1 %v2358_v41 }
  0xe9   :  { %754 = vmatpush.msra.mxu2 %v2348_v38  ;;  %774 = vmatpush.msra.mxu3 %v2306_v22 }
  0xea   :  { %715 = vmatpush.msrb.mxu0 %v2285_v11  ;;  %735 = vmatpush.msrb.mxu1 %v2372_v45 }
  0xeb   :  { %755 = vmatpush.msra.mxu2 %v2360_v42  ;;  %775 = vmatpush.msra.mxu3 %v2312_v26 }
  0xec   :  { %716 = vmatpush.msrb.mxu0 %v2295_v16  ;;  %736 = vmatpush.msrb.mxu1 %v2384_v48 }
  0xed   :  { %756 = vmatpush.msra.mxu2 %v2377_v46  ;;  %776 = vmatpush.msra.mxu3 %v2326_v31 }
  0xee   :  { %717 = vmatpush.msrb.mxu0 %v2303_v20  ;;  %737 = vmatpush.msrb.mxu1 %v2395_v52 }
  0xef   :  { %757 = vmatpush.msra.mxu2 %v2388_v50  ;;  %777 = vmatpush.msra.mxu3 %v2340_v35 }
  0xf0   :  { %718 = vmatpush.msrb.mxu0 %v2309_v24  ;;  %738 = vmatpush.msrb.mxu1 %v2404_v55 }
  0xf1   :  { %758 = vmatpush.msra.mxu2 %v2399_v53  ;;  %778 = vmatpush.msra.mxu3 %v2352_v39 }
  0xf2   :  { %719 = vmatpush.msrb.mxu0 %v2315_v28  ;;  %739 = vmatpush.msrb.mxu1 %v2417_v58 }
  0xf3   :  { %759 = vmatpush.msra.mxu2 %v2409_v56  ;;  %779 = vmatpush.msra.mxu3 %v2364_v43 }
  0xf4   :  { %720 = vmatpush.msrb.mxu0 %v2328_v32  ;;  %740 = vmatpush.msrb.mxu1 %v2426_v60 }
  0xf5   :  { %760 = vmatpush.msra.mxu2 %v2420_v59  ;;  %780 = vmatpush.msra.mxu3 %v2382_v47 }
  0xf6   :  { %721 = vmatpush.msrb.mxu0 %v2342_v36  ;;  %741 = vmatpush.msrb.mxu1 %v2435_v62 }
  0xf7   :  { %761 = vmatpush.msra.mxu2 %v3241_v61  ;;  %781 = vmatpush.msra.mxu3 %v3242_v0 }
  0xf8   :  { %722 = vmatpush.msrb.mxu0 %v3243_v12  ;;  %742 = vmatpush.msrb.mxu1 %v3244_v27 }
  0xf9   :  { %762 = vmatpush.msra.mxu2 %v3245_v1  ;;  %782 = vmatpush.msra.mxu3 %v3246_v14 }
  0xfa   :  { %723 = vmatpush.msrb.mxu0 %v3247_v19  ;;  %743 = vmatpush.msrb.mxu1 %v3248_v17 }
  0xfb   :  { %763 = vmatpush.msra.mxu2 %v3249_v13  ;;  %783 = vmatpush.msra.mxu3 %v3250_v6 }
 0x15f   :  { %v415_v7 = vpop.f32.mrf.mxu0  ;;  %v435_v29 = vpop.f32.mrf.mxu1 }
 0x160   :  { %v416_v54 = vadd.f32 %v415_v7, %v387_v21  ;;  %v436_v63 = vadd.f32 %v435_v29, %v388_v10  ;;  %v3254_v21 = vld [vmem:[#allocation33_spill] sm:$0xff] }
 0x161   :  { %v389_v10 = vrot.slane %v3254_v21, 2 }
 0x162   :  { %v1845_v25 = vmul.f32 -1.442695, %v416_v54  ;;  %v1846_v23 = vmul.f32 -1.442695, %v436_v63 }
 0x164   :  { %1928 = vpow2.f32 %v1845_v25 }
 0x165   :  { %1930 = vpow2.f32 %v1846_v23 }
 0x166   :  { %v475_v51 = vpop.f32.mrf.mxu3  ;;  %v455_v9 = vpop.f32.mrf.mxu2 }
 0x167   :  { %v476_v17 = vadd.f32 %v475_v51, %v390_v40  ;;  %v456_v54 = vadd.f32 %v455_v9, %v389_v10 }
 0x169   :  { %v1847_v19 = vmul.f32 -1.442695, %v476_v17 }
 0x16a   :  { %v1929_v13 = vpop.eup %1928 }
 0x16b   :  { %v1931_v14 = vpop.eup %1930  ;;  %v487_v6 = vadd.f32 1.0, %v1929_v13  ;;  %1932 = vpow2.f32 %v1847_v19 }
 0x16c   :  { %v488_v49 = vadd.f32 1.0, %v1931_v14 }
 0x16d   :  { %1934 = vrcp.f32 %v487_v6  ;;  %v501_v51 = vand.u32 2147483648, %v487_v6  ;;  %v499_v14 = vand.u32 2147483647, %v487_v6  ;;  %vm495_vm1 = vweird.f32 %v487_v6 }
 0x16e   :  { %1936 = vrcp.f32 %v488_v49  ;;  %v516_v13 = vand.u32 2147483648, %v488_v49  ;;  %v514_v27 = vand.u32 2147483647, %v488_v49  ;;  %vm510_vm2 = vweird.f32 %v488_v49 }
 0x16f   :  { %vm500_vm6 = vcmp.eq.f32.partialorder %v499_v14, 8.507059e+37 }
 0x170   :  { %vm515_vm7 = vcmp.eq.f32.partialorder %v514_v27, 8.507059e+37 }
 0x171   :  { %v1933_v1 = vpop.eup %1932 }
 0x172   :  { %v489_v7 = vadd.f32 1.0, %v1933_v1  ;;  %v502_v1 = vor.u32 1.1754944e-38, %v501_v51  ;;  %v1837_v51 = vsel %vm231_vm4, 1.0, %v3240_v44 }
 0x173   :  { %v1935_v29 = vpop.eup %1934 }
 0x174   :  { %v1937_v63 = vpop.eup %1936  ;;  %v491_v25 = vmul.f32 %v1935_v29, %v487_v6  ;;  %1938 = vrcp.f32 %v489_v7  ;;  %vm496_vm15 = vweird.f32 %v1935_v29  ;;  %vm525_vm9 = vweird.f32 %v489_v7 }
 0x175   :  { %v506_v23 = vmul.f32 %v1937_v63, %v488_v49  ;;  %1940 = vtanh.f32 %v456_v54  ;;  %vm511_vm0 = vweird.f32 %v1937_v63  ;;  %vm497_vm3 = vmor %vm495_vm1, %vm496_vm15 }
 0x176   :  { %v492_v40 = vsub.f32 1.0, %v491_v25  ;;  %vm512_vm5 = vmor %vm510_vm2, %vm511_vm0  ;;  %v517_v25 = vor.u32 1.1754944e-38, %v516_v13 }
 0x177   :  { %v507_v17 = vsub.f32 1.0, %v506_v23 }
 0x178   :  { %v493_v19 = vmul.f32 %v1935_v29, %v492_v40 }
 0x179   :  { %v508_v57 = vmul.f32 %v1937_v63, %v507_v17 }
 0x17a   :  { %v1939_v12 = vpop.eup %1938  ;;  %v494_v21 = vadd.f32 %v1935_v29, %v493_v19 }
 0x17b   :  { %v509_v9 = vadd.f32 %v1937_v63, %v508_v57  ;;  %v521_v10 = vmul.f32 %v1939_v12, %v489_v7  ;;  %v1941_v23 = vpop.eup %1940  ;;  %vm526_vm8 = vweird.f32 %v1939_v12 }
 0x17c   :  { %v498_v54 = vsel %vm497_vm3, %v1935_v29, %v494_v21  ;;  %v531_v21 = vand.u32 2147483648, %v489_v7  ;;  %v529_v29 = vand.u32 2147483647, %v489_v7  ;;  %vm527_vm10 = vmor %vm525_vm9, %vm526_vm8 }
 0x17d   :  { %v503_v40 = vsel %vm500_vm6, %v502_v1, %v498_v54  ;;  %v513_v0 = vsel %vm512_vm5, %v1937_v63, %v509_v9  ;;  %v522_v17 = vsub.f32 1.0, %v521_v10 }
 0x17e   :  { %v518_v61 = vsel %vm515_vm7, %v517_v25, %v513_v0  ;;  %v537_v62 = vmul.f32 %v1941_v23, %v503_v40  ;;  %v532_v27 = vor.u32 1.1754944e-38, %v531_v21  ;;  %vm530_vm11 = vcmp.eq.f32.partialorder %v529_v29, 8.507059e+37 }
 0x17f   :  { %v536_v6 = vmul.f32 %v518_v61, %v2583_v3  ;;  %v523_v49 = vmul.f32 %v1939_v12, %v522_v17 }
 0x181   :  { %v538_v57 = vadd.f32 %v537_v62, %v536_v6  ;;  %v524_v19 = vadd.f32 %v1939_v12, %v523_v49 }
 0x183   :  { %1942 = vtanh.f32 %v538_v57  ;;  %v2644_v4 = vmul.f32 %v1837_v51, %v538_v57  ;;  %v528_v63 = vsel %vm527_vm10, %v1939_v12, %v524_v19 }
 0x184   :  { %v533_v13 = vsel %vm530_vm11, %v532_v27, %v528_v63 }
 0x189   :  { %v1943_v0 = vpop.eup %1942 }
 0x18a   :  { %v540_v14 = vmul.f32 %v1943_v0, %v533_v13 }
 0x18c   :  { %v541_v3 = vmul.f32 %v1837_v51, %v540_v14 }
 0x18e   :  { %1848 = vmatmul.msk.f32.vlgmr.msra.gmra.mxu0 %vm234_vm14, %v541_v3  ;;  %1849 = vmatmul.msk.f32.vlgmr.msra.gmra.mxu1 %vm234_vm14, %v541_v3 }
 0x18f   :  { %1850 = vmatmul.msk.f32.vlgmr.msrb.gmra.mxu2 %vm234_vm14, %v541_v3  ;;  %1851 = vmatmul.msk.f32.vlgmr.msrb.gmra.mxu3 %vm234_vm14, %v541_v3 }
 0x190   :  { %858 = vmatpush.msra.mxu0 %v2277_v2  ;;  %878 = vmatpush.msra.mxu1 %v2333_v33  ;;  %v3255_v2 = vld [vmem:[#allocation17_spill] sm:$0xff] }
 0x191   :  { %898 = vmatpush.msrb.mxu2 %v2323_v30  ;;  %918 = vmatpush.msrb.mxu3 %v2293_v15  ;;  %v3259_v15 = vld [vmem:[#allocation19_spill] sm:$0xff] }
 0x192   :  { %859 = vmatpush.msra.mxu0 %v2279_v5  ;;  %879 = vmatpush.msra.mxu1 %v2346_v37  ;;  %v3256_v5 = vld [vmem:[#allocation16_spill] sm:$0xff] }
 0x193   :  { %899 = vmatpush.msrb.mxu2 %v2335_v34  ;;  %919 = vmatpush.msrb.mxu3 %v2300_v18  ;;  %v3261_v18 = vld [vmem:[#allocation14_spill] sm:$0xff] }
 0x194   :  { %860 = vmatpush.msra.mxu0 %v2282_v8  ;;  %880 = vmatpush.msra.mxu1 %v2358_v41  ;;  %v3257_v8 = vld [vmem:[#allocation13_spill] sm:$0xff] }
 0x195   :  { %900 = vmatpush.msrb.mxu2 %v2348_v38  ;;  %920 = vmatpush.msrb.mxu3 %v2306_v22  ;;  %v3263_v22 = vld [vmem:[#allocation21_spill] sm:$0xff] }
 0x196   :  { %861 = vmatpush.msra.mxu0 %v2285_v11  ;;  %881 = vmatpush.msra.mxu1 %v2372_v45  ;;  %v3258_v11 = vld [vmem:[#allocation11_spill] sm:$0xff] }
 0x197   :  { %901 = vmatpush.msrb.mxu2 %v2360_v42  ;;  %921 = vmatpush.msrb.mxu3 %v2312_v26  ;;  %v3265_v26 = vld [vmem:[#allocation15_spill] sm:$0xff] }
 0x198   :  { %862 = vmatpush.msra.mxu0 %v2295_v16  ;;  %882 = vmatpush.msra.mxu1 %v2384_v48  ;;  %v3260_v16 = vld [vmem:[#allocation18_spill] sm:$0xff] }
 0x199   :  { %902 = vmatpush.msrb.mxu2 %v2377_v46  ;;  %922 = vmatpush.msrb.mxu3 %v2326_v31  ;;  %v3267_v31 = vld [vmem:[#allocation30_spill] sm:$0xff] }
 0x19a   :  { %863 = vmatpush.msra.mxu0 %v2303_v20  ;;  %883 = vmatpush.msra.mxu1 %v2395_v52  ;;  %v3262_v20 = vld [vmem:[#allocation12_spill] sm:$0xff] }
 0x19b   :  { %903 = vmatpush.msrb.mxu2 %v2388_v50  ;;  %923 = vmatpush.msrb.mxu3 %v2340_v35 }
 0x19c   :  { %864 = vmatpush.msra.mxu0 %v2309_v24  ;;  %884 = vmatpush.msra.mxu1 %v2404_v55  ;;  %v3264_v24 = vld [vmem:[#allocation20_spill] sm:$0xff]  ;;  %v3269_v55 = vld [vmem:[#allocation33_spill] sm:$0xff] }
 0x19d   :  { %904 = vmatpush.msrb.mxu2 %v2399_v53  ;;  %924 = vmatpush.msrb.mxu3 %v2352_v39  ;;  %v3268_v39 = vld [vmem:[#allocation28_spill] sm:$0xff] }
 0x19e   :  { %865 = vmatpush.msra.mxu0 %v2315_v28  ;;  %885 = vmatpush.msra.mxu1 %v2417_v58  ;;  %v3266_v28 = vld [vmem:[#allocation24_spill] sm:$0xff]  ;;  %v546_v41 = vrot.slane %v3268_v39, 4 }
 0x19f   :  { %905 = vmatpush.msrb.mxu2 %v2409_v56  ;;  %925 = vmatpush.msrb.mxu3 %v2364_v43  ;;  %v543_v30 = vrot.slane %v3266_v28, 4  ;;  %v545_v56 = vrot.slane %v3269_v55, 4 }
 0x1a0   :  { %866 = vmatpush.msra.mxu0 %v2328_v32  ;;  %886 = vmatpush.msra.mxu1 %v2426_v60  ;;  %v544_v32 = vrot.slane %v3267_v31, 4 }
 0x1a1   :  { %906 = vmatpush.msrb.mxu2 %v2420_v59  ;;  %926 = vmatpush.msrb.mxu3 %v2382_v47 }
 0x1a2   :  { %867 = vmatpush.msra.mxu0 %v2342_v36  ;;  %887 = vmatpush.msra.mxu1 %v3255_v2 }
 0x1a3   :  { %907 = vmatpush.msrb.mxu2 %v3256_v5  ;;  %927 = vmatpush.msrb.mxu3 %v3257_v8 }
 0x1a4   :  { %868 = vmatpush.msra.mxu0 %v3258_v11  ;;  %888 = vmatpush.msra.mxu1 %v3259_v15 }
 0x1a5   :  { %908 = vmatpush.msrb.mxu2 %v3260_v16  ;;  %928 = vmatpush.msrb.mxu3 %v3261_v18 }
 0x1a6   :  { %869 = vmatpush.msra.mxu0 %v3262_v20  ;;  %889 = vmatpush.msra.mxu1 %v3263_v22 }
 0x1a7   :  { %909 = vmatpush.msrb.mxu2 %v3264_v24  ;;  %929 = vmatpush.msrb.mxu3 %v3265_v26 }
 0x20b   :  { %v571_v33 = vpop.f32.mrf.mxu0  ;;  %v591_v34 = vpop.f32.mrf.mxu1 }
 0x20c   :  { %v572_v35 = vadd.f32 %v571_v33, %v543_v30  ;;  %v592_v36 = vadd.f32 %v591_v34, %v544_v32 }
 0x20e   :  { %v1852_v37 = vmul.f32 -1.442695, %v572_v35  ;;  %v1853_v38 = vmul.f32 -1.442695, %v592_v36 }
 0x210   :  { %1944 = vpow2.f32 %v1852_v37  ;;  %v2713_v37 = vld [vmem:[#allocation2 + $0x168] sm:$0xff] }
 0x211   :  { %1946 = vpow2.f32 %v1853_v38  ;;  %v2716_v38 = vld [vmem:[#allocation2 + $0x170] sm:$0xff] }
 0x212   :  { %v631_v42 = vpop.f32.mrf.mxu3  ;;  %v611_v52 = vpop.f32.mrf.mxu2 }
 0x213   :  { %v632_v43 = vadd.f32 %v631_v42, %v546_v41  ;;  %v612_v44 = vadd.f32 %v611_v52, %v545_v56  ;;  %v2719_v41 = vld [vmem:[#allocation2 + $0x178] sm:$0xff]  ;;  %v2722_v42 = vld [vmem:[#allocation2 + $0x140] sm:$0xff]  ;;  %v2749_v56 = vld [vmem:[#allocation2 + $0x108] sm:$0xff] }
 0x214   :  { %v2743_v52 = vld [vmem:[#allocation2 + $0x138] sm:$0xff] }
 0x215   :  { %v1854_v45 = vmul.f32 -1.442695, %v632_v43  ;;  %v2725_v43 = vld [vmem:[#allocation2 + $0x148] sm:$0xff] }
 0x216   :  { %v1945_v46 = vpop.eup %1944 }
 0x217   :  { %v1947_v47 = vpop.eup %1946  ;;  %v643_v48 = vadd.f32 1.0, %v1945_v46  ;;  %1948 = vpow2.f32 %v1854_v45  ;;  %v2728_v45 = vld [vmem:[#allocation2 + $0x150] sm:$0xff]  ;;  %v2731_v46 = vld [vmem:[#allocation2 + $0x158] sm:$0xff] }
 0x218   :  { %v644_v50 = vadd.f32 1.0, %v1947_v47  ;;  %v2734_v47 = vld [vmem:[#allocation2 + $0x120] sm:$0xff] }
 0x219   :  { %1950 = vrcp.f32 %v643_v48  ;;  %v657_v10 = vand.u32 2147483648, %v643_v48  ;;  %v655_v23 = vand.u32 2147483647, %v643_v48  ;;  %vm651_vm15 = vweird.f32 %v643_v48 }
 0x21a   :  { %1952 = vrcp.f32 %v644_v50  ;;  %v672_v25 = vand.u32 2147483648, %v644_v50  ;;  %v670_v17 = vand.u32 2147483647, %v644_v50  ;;  %vm666_vm0 = vweird.f32 %v644_v50 }
 0x21b   :  { %v658_v51 = vor.u32 1.1754944e-38, %v657_v10  ;;  %vm656_vm3 = vcmp.eq.f32.partialorder %v655_v23, 8.507059e+37  ;;  %v2776_v10 = vld [vmem:[#allocation2 + $0xd0] sm:$0xff]  ;;  %v2785_v23 = vld [vmem:[#allocation2 + $0xa8] sm:$0xff] }
 0x21c   :  { %v673_v21 = vor.u32 1.1754944e-38, %v672_v25  ;;  %vm671_vm4 = vcmp.eq.f32.partialorder %v670_v17, 8.507059e+37  ;;  %v2779_v25 = vld [vmem:[#allocation2 + $0xd8] sm:$0xff] }
 0x21d   :  { %v1949_v53 = vpop.eup %1948  ;;  %v2791_v17 = vld [vmem:[#allocation2 + $0xb8] sm:$0xff] }
 0x21e   :  { %v645_v59 = vadd.f32 1.0, %v1949_v53  ;;  %v2746_v53 = vld [vmem:[#allocation2 + $0x100] sm:$0xff] }
 0x21f   :  { %v1951_v62 = vpop.eup %1950 }
 0x220   :  { %v1953_v61 = vpop.eup %1952  ;;  %v647_v12 = vmul.f32 %v1951_v62, %v643_v48  ;;  %1954 = vrcp.f32 %v645_v59  ;;  %vm652_vm12 = vweird.f32 %v1951_v62  ;;  %v687_v26 = vand.u32 2147483648, %v645_v59  ;;  %v2737_v48 = vld [vmem:[#allocation2 + $0x128] sm:$0xff] }
 0x221   :  { %v662_v7 = vmul.f32 %v1953_v61, %v644_v50  ;;  %1956 = vtanh.f32 %v612_v44  ;;  %vm667_vm13 = vweird.f32 %v1953_v61  ;;  %vm653_vm1 = vmor %vm651_vm15, %vm652_vm12  ;;  %vm681_vm6 = vweird.f32 %v645_v59  ;;  %v2740_v50 = vld [vmem:[#allocation2 + $0x130] sm:$0xff]  ;;  %v2758_v44 = vld [vmem:[#allocation2 + $0xe0] sm:$0xff] }
 0x222   :  { %v648_v1 = vsub.f32 1.0, %v647_v12  ;;  %vm668_vm2 = vmor %vm666_vm0, %vm667_vm13  ;;  %v685_v30 = vand.u32 2147483647, %v645_v59  ;;  %v688_v33 = vor.u32 1.1754944e-38, %v687_v26  ;;  %v2764_v12 = vld [vmem:[#allocation2 + $0xf0] sm:$0xff] }
 0x223   :  { %v663_v9 = vsub.f32 1.0, %v662_v7  ;;  %v2767_v7 = vld [vmem:[#allocation2 + $0xf8] sm:$0xff] }
 0x224   :  { %v649_v54 = vmul.f32 %v1951_v62, %v648_v1  ;;  %vm686_vm8 = vcmp.eq.f32.partialorder %v685_v30, 8.507059e+37  ;;  %v2770_v1 = vld [vmem:[#allocation2 + $0xc0] sm:$0xff] }
 0x225   :  { %v664_v40 = vmul.f32 %v1953_v61, %v663_v9  ;;  %v2773_v9 = vld [vmem:[#allocation2 + $0xc8] sm:$0xff] }
 0x226   :  { %v1955_v6 = vpop.eup %1954  ;;  %v650_v49 = vadd.f32 %v1951_v62, %v649_v54  ;;  %v2782_v54 = vld [vmem:[#allocation2 + $0xa0] sm:$0xff] }
 0x227   :  { %v665_v57 = vadd.f32 %v1953_v61, %v664_v40  ;;  %v677_v19 = vmul.f32 %v1955_v6, %v645_v59  ;;  %v1957_v63 = vpop.eup %1956  ;;  %vm682_vm5 = vweird.f32 %v1955_v6  ;;  %v2752_v59 = vld [vmem:[#allocation2 + $0x110] sm:$0xff] }
 0x228   :  { %v654_v29 = vsel %vm653_vm1, %v1951_v62, %v650_v49  ;;  %vm683_vm7 = vmor %vm681_vm6, %vm682_vm5  ;;  %v2755_v62 = vld [vmem:[#allocation2 + $0x118] sm:$0xff]  ;;  %v2788_v40 = vld [vmem:[#allocation2 + $0xb0] sm:$0xff] }
 0x229   :  { %v659_v27 = vsel %vm656_vm3, %v658_v51, %v654_v29  ;;  %v669_v0 = vsel %vm668_vm2, %v1953_v61, %v665_v57  ;;  %v678_v13 = vsub.f32 1.0, %v677_v19  ;;  %v2761_v61 = vld [vmem:[#allocation2 + $0xe8] sm:$0xff]  ;;  %v2798_v49 = vld [vmem:[#allocation2 + $0x90] sm:$0xff]  ;;  %v2801_v51 = vld [vmem:[#allocation2 + $0x98] sm:$0xff] }
 0x22a   :  { %v674_v14 = vsel %vm671_vm4, %v673_v21, %v669_v0  ;;  %v693_v3 = vmul.f32 %v1957_v63, %v659_v27  ;;  %v2804_v57 = vld [vmem:[#allocation2 + $0x60] sm:$0xff]  ;;  %v2808_v19 = vld [vmem:[#allocation2 + $0x70] sm:$0xff]  ;;  %v2811_v21 = vld [vmem:[#allocation2 + $0x78] sm:$0xff] }
 0x22b   :  { %v692_v8 = vmul.f32 %v674_v14, %v2644_v4  ;;  %v679_v11 = vmul.f32 %v1955_v6, %v678_v13  ;;  %v2710_v4 = vld [vmem:[#allocation2 + $0x160] sm:$0xff]  ;;  %v2819_v29 = vld [vmem:[#allocation2 + $0x58] sm:$0xff] }
 0x22c   :  { %3270 = vst [vmem:[#allocation17_spill] sm:$0xff] %v2819_v29  ;;  %v2827_v63 = vld [vmem:[#allocation2 + $0x38] sm:$0xff]  ;;  %v2830_v27 = vld [vmem:[#allocation2] sm:$0xff] }
 0x22d   :  { %v2703_v18 = vadd.f32 %v693_v3, %v692_v8  ;;  %v680_v20 = vadd.f32 %v1955_v6, %v679_v11  ;;  %3272 = vst [vmem:[#allocation13_spill] sm:$0xff] %v2827_v63 }
 0x22e   :  { %3273 = vst [vmem:[#allocation11_spill] sm:$0xff] %v2830_v27 }
 0x22f   :  { %1958 = vtanh.f32 %v2703_v18  ;;  %v684_v32 = vsel %vm683_vm7, %v1955_v6, %v680_v20  ;;  %v2794_v6 = vld [vmem:[#allocation2 + $0x80] sm:$0xff] }
 0x230   :  { %v689_v35 = vsel %vm686_vm8, %v688_v33, %v684_v32 }
 0x235   :  { %v1959_v34 = vpop.eup %1958 }
 0x236   :  { %v696_v36 = vmul.f32 %v1959_v34, %v689_v35  ;;  %v699_v34 = vrot.slane %v3269_v55, 6 }
 0x238   :  { %1855 = vmatmul.msk.f32.vlgmr.msrb.gmra.mxu0 %vm234_vm14, %v696_v36  ;;  %1856 = vmatmul.msk.f32.vlgmr.msrb.gmra.mxu1 %vm234_vm14, %v696_v36 }
 0x239   :  { %1857 = vmatmul.msk.f32.vlgmr.msra.gmra.mxu2 %vm234_vm14, %v696_v36  ;;  %1858 = vmatmul.msk.f32.vlgmr.msra.gmra.mxu3 %vm234_vm14, %v696_v36 }
 0x23a   :  { %1016 = vmatpush.msrb.mxu0 %v2710_v4  ;;  %1036 = vmatpush.msrb.mxu1 %v2713_v37 }
 0x23b   :  { %1056 = vmatpush.msra.mxu2 %v2716_v38  ;;  %1076 = vmatpush.msra.mxu3 %v2719_v41 }
 0x23c   :  { %1017 = vmatpush.msrb.mxu0 %v2722_v42  ;;  %1037 = vmatpush.msrb.mxu1 %v2725_v43 }
 0x23d   :  { %1057 = vmatpush.msra.mxu2 %v2728_v45  ;;  %1077 = vmatpush.msra.mxu3 %v2731_v46 }
 0x23e   :  { %1018 = vmatpush.msrb.mxu0 %v2734_v47  ;;  %1038 = vmatpush.msrb.mxu1 %v2737_v48 }
 0x23f   :  { %1058 = vmatpush.msra.mxu2 %v2740_v50  ;;  %1078 = vmatpush.msra.mxu3 %v2743_v52 }
 0x240   :  { %1019 = vmatpush.msrb.mxu0 %v2746_v53  ;;  %1039 = vmatpush.msrb.mxu1 %v2749_v56 }
 0x241   :  { %1059 = vmatpush.msra.mxu2 %v2752_v59  ;;  %1079 = vmatpush.msra.mxu3 %v2755_v62 }
 0x242   :  { %1020 = vmatpush.msrb.mxu0 %v2758_v44  ;;  %1040 = vmatpush.msrb.mxu1 %v2761_v61 }
 0x243   :  { %1060 = vmatpush.msra.mxu2 %v2764_v12  ;;  %1080 = vmatpush.msra.mxu3 %v2767_v7 }
 0x244   :  { %1021 = vmatpush.msrb.mxu0 %v2770_v1  ;;  %1041 = vmatpush.msrb.mxu1 %v2773_v9 }
 0x245   :  { %1061 = vmatpush.msra.mxu2 %v2776_v10  ;;  %1081 = vmatpush.msra.mxu3 %v2779_v25 }
 0x246   :  { %1022 = vmatpush.msrb.mxu0 %v2782_v54  ;;  %1042 = vmatpush.msrb.mxu1 %v2785_v23 }
 0x247   :  { %1062 = vmatpush.msra.mxu2 %v2788_v40  ;;  %1082 = vmatpush.msra.mxu3 %v2791_v17 }
 0x248   :  { %1023 = vmatpush.msrb.mxu0 %v2794_v6  ;;  %1043 = vmatpush.msrb.mxu1 %v2417_v58  ;;  %v2814_v58 = vld [vmem:[#allocation2 + $0x40] sm:$0xff] }
 0x249   :  { %1063 = vmatpush.msra.mxu2 %v2798_v49  ;;  %1083 = vmatpush.msra.mxu3 %v2801_v51 }
 0x24a   :  { %1024 = vmatpush.msrb.mxu0 %v2804_v57  ;;  %1044 = vmatpush.msrb.mxu1 %v2426_v60  ;;  %v2822_v60 = vld [vmem:[#allocation2 + $0x20] sm:$0xff] }
 0x24b   :  { %1064 = vmatpush.msra.mxu2 %v2808_v19  ;;  %1084 = vmatpush.msra.mxu3 %v2811_v21  ;;  %3271 = vst [vmem:[#allocation16_spill] sm:$0xff] %v2822_v60 }
 0x24c   :  { %1025 = vmatpush.msrb.mxu0 %v2814_v58  ;;  %1045 = vmatpush.msrb.mxu1 %v3255_v2  ;;  %v2835_v2 = vld [vmem:[#allocation2 + $0x18] sm:$0xff] }
 0x24d   :  { %1065 = vmatpush.msra.mxu2 %v3256_v5  ;;  %1085 = vmatpush.msra.mxu3 %v2819_v29  ;;  %3274 = vst [vmem:[#allocation19_spill] sm:$0xff] %v2835_v2  ;;  %v697_v5 = vrot.slane %v3266_v28, 6 }
 0x24e   :  { %1026 = vmatpush.msrb.mxu0 %v2822_v60  ;;  %1046 = vmatpush.msrb.mxu1 %v3259_v15  ;;  %v698_v15 = vrot.slane %v3267_v31, 6 }
 0x24f   :  { %1066 = vmatpush.msra.mxu2 %v3260_v16  ;;  %1086 = vmatpush.msra.mxu3 %v2827_v63 }
 0x250   :  { %1027 = vmatpush.msrb.mxu0 %v2830_v27  ;;  %1047 = vmatpush.msrb.mxu1 %v3263_v22  ;;  %v700_v22 = vrot.slane %v3268_v39, 6 }
 0x251   :  { %1067 = vmatpush.msra.mxu2 %v3264_v24  ;;  %1087 = vmatpush.msra.mxu3 %v2835_v2 }
 0x2b5   :  { %v725_v16 = vpop.f32.mrf.mxu0  ;;  %v745_v0 = vpop.f32.mrf.mxu1 }
 0x2b6   :  { %v726_v13 = vadd.f32 %v725_v16, %v697_v5  ;;  %v746_v14 = vadd.f32 %v745_v0, %v698_v15 }
 0x2b8   :  { %v1859_v3 = vmul.f32 -1.442695, %v726_v13  ;;  %v1860_v8 = vmul.f32 -1.442695, %v746_v14 }
 0x2ba   :  { %1960 = vpow2.f32 %v1859_v3 }
 0x2bb   :  { %1962 = vpow2.f32 %v1860_v8 }
 0x2bc   :  { %v785_v11 = vpop.f32.mrf.mxu3  ;;  %v765_v31 = vpop.f32.mrf.mxu2 }
 0x2bd   :  { %v786_v24 = vadd.f32 %v785_v11, %v700_v22  ;;  %v766_v5 = vadd.f32 %v765_v31, %v699_v34 }
 0x2bf   :  { %v1861_v20 = vmul.f32 -1.442695, %v786_v24 }
 0x2c0   :  { %v1961_v26 = vpop.eup %1960 }
 0x2c1   :  { %v1963_v30 = vpop.eup %1962  ;;  %v797_v32 = vadd.f32 1.0, %v1961_v26  ;;  %1964 = vpow2.f32 %v1861_v20 }
 0x2c2   :  { %v798_v28 = vadd.f32 1.0, %v1963_v30 }
 0x2c3   :  { %1966 = vrcp.f32 %v797_v32  ;;  %v811_v14 = vand.u32 2147483648, %v797_v32  ;;  %v809_v22 = vand.u32 2147483647, %v797_v32  ;;  %vm805_vm11 = vweird.f32 %v797_v32 }
 0x2c4   :  { %1968 = vrcp.f32 %v798_v28  ;;  %v826_v3 = vand.u32 2147483648, %v798_v28  ;;  %v824_v24 = vand.u32 2147483647, %v798_v28  ;;  %vm820_vm12 = vweird.f32 %v798_v28 }
 0x2c5   :  { %v812_v26 = vor.u32 1.1754944e-38, %v811_v14  ;;  %vm810_vm0 = vcmp.eq.f32.partialorder %v809_v22, 8.507059e+37 }
 0x2c6   :  { %vm825_vm1 = vcmp.eq.f32.partialorder %v824_v24, 8.507059e+37 }
 0x2c7   :  { %v1965_v33 = vpop.eup %1964 }
 0x2c8   :  { %v799_v35 = vadd.f32 1.0, %v1965_v33  ;;  %v827_v33 = vor.u32 1.1754944e-38, %v826_v3 }
 0x2c9   :  { %v1967_v36 = vpop.eup %1966 }
 0x2ca   :  { %v1969_v15 = vpop.eup %1968  ;;  %v801_v16 = vmul.f32 %v1967_v36, %v797_v32  ;;  %1970 = vrcp.f32 %v799_v35  ;;  %vm806_vm9 = vweird.f32 %v1967_v36  ;;  %v841_v14 = vand.u32 2147483648, %v799_v35 }
 0x2cb   :  { %v816_v39 = vmul.f32 %v1969_v15, %v798_v28  ;;  %1972 = vtanh.f32 %v766_v5  ;;  %vm821_vm10 = vweird.f32 %v1969_v15  ;;  %vm807_vm13 = vmor %vm805_vm11, %vm806_vm9  ;;  %vm835_vm3 = vweird.f32 %v799_v35 }
 0x2cc   :  { %v802_v0 = vsub.f32 1.0, %v801_v16  ;;  %vm822_vm15 = vmor %vm820_vm12, %vm821_vm10  ;;  %v842_v22 = vor.u32 1.1754944e-38, %v841_v14 }
 0x2cd   :  { %v817_v13 = vsub.f32 1.0, %v816_v39 }
 0x2ce   :  { %v803_v8 = vmul.f32 %v1967_v36, %v802_v0 }
 0x2cf   :  { %v818_v11 = vmul.f32 %v1969_v15, %v817_v13 }
 0x2d0   :  { %v1971_v20 = vpop.eup %1970  ;;  %v804_v55 = vadd.f32 %v1967_v36, %v803_v8 }
 0x2d1   :  { %v819_v30 = vadd.f32 %v1969_v15, %v818_v11  ;;  %v831_v31 = vmul.f32 %v1971_v20, %v799_v35  ;;  %v1973_v5 = vpop.eup %1972  ;;  %vm836_vm2 = vweird.f32 %v1971_v20 }
 0x2d2   :  { %v808_v34 = vsel %vm807_vm13, %v1967_v36, %v804_v55  ;;  %v839_v36 = vand.u32 2147483647, %v799_v35  ;;  %vm837_vm4 = vmor %vm835_vm3, %vm836_vm2  ;;  %v2894_v35 = vld [vmem:[#allocation2 + $0x50] sm:$0xff] }
 0x2d3   :  { %v813_v16 = vsel %vm810_vm0, %v812_v26, %v808_v34  ;;  %v823_v39 = vsel %vm822_vm15, %v1969_v15, %v819_v30  ;;  %v832_v0 = vsub.f32 1.0, %v831_v31  ;;  %3275 = vst [vmem:[#allocation18_spill] sm:$0xff] %v2894_v35  ;;  %v2902_v55 = vld [vmem:[#allocation2 + $0x30] sm:$0xff]  ;;  %v3278_v26 = vld [vmem:[#allocation11_spill] sm:$0xff] }
 0x2d4   :  { %v828_v13 = vsel %vm825_vm1, %v827_v33, %v823_v39  ;;  %v847_v2 = vmul.f32 %v1973_v5, %v813_v16  ;;  %vm840_vm5 = vcmp.eq.f32.partialorder %v839_v36, 8.507059e+37  ;;  %3277 = vst [vmem:[#allocation12_spill] sm:$0xff] %v2902_v55  ;;  %v2907_v30 = vld [vmem:[#allocation2 + $0x8] sm:$0xff]  ;;  %v2910_v31 = vld [vmem:[#allocation2 + $0x10] sm:$0xff]  ;;  %v3283_v5 = vld [vmem:[#allocation22_spill] sm:$0xff] }
 0x2d5   :  { %v846_v27 = vmul.f32 %v828_v13, %v2703_v18  ;;  %v833_v8 = vmul.f32 %v1971_v20, %v832_v0  ;;  %v2879_v18 = vld [vmem:[#allocation2 + $0x88] sm:$0xff]  ;;  %3279 = vst [vmem:[#allocation21_spill] sm:$0xff] %v2907_v30  ;;  %v3285_v39 = vld [vmem:[#allocation29_spill] sm:$0xff] }
 0x2d6   :  { %3280 = vst [vmem:[#allocation20_spill] sm:$0xff] %v2910_v31  ;;  %v3281_v33 = vld [vmem:[#allocation19_spill] sm:$0xff] }
 0x2d7   :  { %v2843_v32 = vadd.f32 %v847_v2, %v846_v27  ;;  %v834_v28 = vadd.f32 %v1971_v20, %v833_v8  ;;  %v2885_v27 = vld [vmem:[#allocation2 + $0x68] sm:$0xff] }
 0x2d8   :  { %v2891_v2 = vld [vmem:[#allocation2 + $0x48] sm:$0xff] }
 0x2d9   :  { %1974 = vtanh.f32 %v2843_v32  ;;  %v838_v3 = vsel %vm837_vm4, %v1971_v20, %v834_v28  ;;  %v2899_v20 = vld [vmem:[#allocation2 + $0x28] sm:$0xff] }
 0x2da   :  { %v843_v11 = vsel %vm840_vm5, %v842_v22, %v838_v3  ;;  %3276 = vst [vmem:[#allocation14_spill] sm:$0xff] %v2899_v20  ;;  %v3282_v34 = vld [vmem:[#allocation23_spill] sm:$0xff] }
 0x2db   :  { %v2916_v16 = vadd.f32 %v3283_v5, %v3282_v34  ;;  %v3286_v0 = vld [vmem:[#allocation27_spill] sm:$0xff] }
 0x2dc   :  { %v2920_v13 = vadd.f32 %v3286_v0, %v3285_v39 }
 0x2dd   :  { %3284 = vst [vmem:[#allocation15_spill] sm:$0xff] %v2916_v16 }
 0x2de   :  { %3287 = vst [vmem:[#allocation24_spill] sm:$0xff] %v2920_v13 }
 0x2df   :  { %v1975_v15 = vpop.eup %1974 }
 0x2e0   :  { %v850_v24 = vmul.f32 %v1975_v15, %v843_v11  ;;  %v3288_v15 = vld [vmem:[#allocation26_spill] sm:$0xff]  ;;  %v3289_v11 = vld [vmem:[#allocation25_spill] sm:$0xff] }
 0x2e2   :  { %1862 = vmatmul.msk.f32.vlgmr.msra.gmra.mxu0 %vm234_vm14, %v850_v24  ;;  %1863 = vmatmul.msk.f32.vlgmr.msra.gmra.mxu1 %vm234_vm14, %v850_v24 }
 0x2e3   :  { %1864 = vmatmul.msk.f32.vlgmr.msrb.gmra.mxu2 %vm234_vm14, %v850_v24  ;;  %1865 = vmatmul.msk.f32.vlgmr.msrb.gmra.mxu3 %vm234_vm14, %v850_v24  ;;  %v2926_v24 = vadd.f32 %v3289_v11, %v3288_v15 }
 0x2e4   :  { %1170 = vmatpush.msra.mxu0 %v2710_v4  ;;  %1190 = vmatpush.msra.mxu1 %v2713_v37 }
 0x2e5   :  { %1210 = vmatpush.msrb.mxu2 %v2716_v38  ;;  %1230 = vmatpush.msrb.mxu3 %v2719_v41  ;;  %3290 = vst [vmem:[#allocation30_spill] sm:$0xff] %v2926_v24 }
 0x2e6   :  { %1171 = vmatpush.msra.mxu0 %v2722_v42  ;;  %1191 = vmatpush.msra.mxu1 %v2725_v43 }
 0x2e7   :  { %1211 = vmatpush.msrb.mxu2 %v2728_v45  ;;  %1231 = vmatpush.msrb.mxu3 %v2731_v46 }
 0x2e8   :  { %1172 = vmatpush.msra.mxu0 %v2734_v47  ;;  %1192 = vmatpush.msra.mxu1 %v2737_v48 }
 0x2e9   :  { %1212 = vmatpush.msrb.mxu2 %v2740_v50  ;;  %1232 = vmatpush.msrb.mxu3 %v2743_v52 }
 0x2ea   :  { %1173 = vmatpush.msra.mxu0 %v2746_v53  ;;  %1193 = vmatpush.msra.mxu1 %v2749_v56 }
 0x2eb   :  { %1213 = vmatpush.msrb.mxu2 %v2752_v59  ;;  %1233 = vmatpush.msrb.mxu3 %v2755_v62 }
 0x2ec   :  { %1174 = vmatpush.msra.mxu0 %v2758_v44  ;;  %1194 = vmatpush.msra.mxu1 %v2761_v61 }
 0x2ed   :  { %1214 = vmatpush.msrb.mxu2 %v2764_v12  ;;  %1234 = vmatpush.msrb.mxu3 %v2767_v7 }
 0x2ee   :  { %1175 = vmatpush.msra.mxu0 %v2770_v1  ;;  %1195 = vmatpush.msra.mxu1 %v2773_v9 }
 0x2ef   :  { %1215 = vmatpush.msrb.mxu2 %v2776_v10  ;;  %1235 = vmatpush.msrb.mxu3 %v2779_v25 }
 0x2f0   :  { %1176 = vmatpush.msra.mxu0 %v2782_v54  ;;  %1196 = vmatpush.msra.mxu1 %v2785_v23 }
 0x2f1   :  { %1216 = vmatpush.msrb.mxu2 %v2788_v40  ;;  %1236 = vmatpush.msrb.mxu3 %v2791_v17 }
 0x2f2   :  { %1177 = vmatpush.msra.mxu0 %v2794_v6  ;;  %1197 = vmatpush.msra.mxu1 %v2879_v18 }
 0x2f3   :  { %1217 = vmatpush.msrb.mxu2 %v2798_v49  ;;  %1237 = vmatpush.msrb.mxu3 %v2801_v51 }
 0x2f4   :  { %1178 = vmatpush.msra.mxu0 %v2804_v57  ;;  %1198 = vmatpush.msra.mxu1 %v2885_v27 }
 0x2f5   :  { %1218 = vmatpush.msrb.mxu2 %v2808_v19  ;;  %1238 = vmatpush.msrb.mxu3 %v2811_v21 }
 0x2f6   :  { %1179 = vmatpush.msra.mxu0 %v2814_v58  ;;  %1199 = vmatpush.msra.mxu1 %v2891_v2 }
 0x2f7   :  { %1219 = vmatpush.msrb.mxu2 %v2894_v35  ;;  %1239 = vmatpush.msrb.mxu3 %v2819_v29 }
 0x2f8   :  { %1180 = vmatpush.msra.mxu0 %v2822_v60  ;;  %1200 = vmatpush.msra.mxu1 %v2899_v20 }
 0x2f9   :  { %1220 = vmatpush.msrb.mxu2 %v2902_v55  ;;  %1240 = vmatpush.msrb.mxu3 %v2827_v63 }
 0x2fa   :  { %1181 = vmatpush.msra.mxu0 %v3278_v26  ;;  %1201 = vmatpush.msra.mxu1 %v2907_v30 }
 0x2fb   :  { %1221 = vmatpush.msrb.mxu2 %v2910_v31  ;;  %1241 = vmatpush.msrb.mxu3 %v3281_v33 }
 0x35f   :  { %v871_v8 = vpop.f32.mrf.mxu0  ;;  %v891_v28 = vpop.f32.mrf.mxu1 }
 0x360   :  { %v872_v14 = vadd.f32 %v871_v8, %v2916_v16  ;;  %v892_v36 = vadd.f32 %v891_v28, %v2920_v13 }
 0x362   :  { %v1866_v3 = vmul.f32 -1.442695, %v872_v14  ;;  %v1867_v22 = vmul.f32 -1.442695, %v892_v36  ;;  %v3291_v14 = vld [vmem:[#allocation32_spill] sm:$0xff]  ;;  %v3292_v36 = vld [vmem:[#allocation31_spill] sm:$0xff] }
 0x364   :  { %1976 = vpow2.f32 %v1866_v3  ;;  %v2931_v3 = vadd.f32 %v3292_v36, %v3291_v14 }
 0x365   :  { %1978 = vpow2.f32 %v1867_v22 }
 0x366   :  { %v931_v5 = vpop.f32.mrf.mxu3  ;;  %v911_v8 = vpop.f32.mrf.mxu2  ;;  %3293 = vst [vmem:[#allocation28_spill] sm:$0xff] %v2931_v3 }
 0x367   :  { %v932_v34 = vadd.f32 %v931_v5, %v2926_v24  ;;  %v912_v22 = vadd.f32 %v911_v8, %v2931_v3 }
 0x369   :  { %v1868_v33 = vmul.f32 -1.442695, %v932_v34 }
 0x36a   :  { %v1977_v0 = vpop.eup %1976 }
 0x36b   :  { %v1979_v39 = vpop.eup %1978  ;;  %v943_v31 = vadd.f32 1.0, %v1977_v0  ;;  %1980 = vpow2.f32 %v1868_v33 }
 0x36c   :  { %v944_v30 = vadd.f32 1.0, %v1979_v39 }
 0x36d   :  { %1982 = vrcp.f32 %v943_v31  ;;  %v957_v33 = vand.u32 2147483648, %v943_v31  ;;  %v955_v26 = vand.u32 2147483647, %v943_v31  ;;  %vm951_vm8 = vweird.f32 %v943_v31 }
 0x36e   :  { %1984 = vrcp.f32 %v944_v30  ;;  %v972_v39 = vand.u32 2147483648, %v944_v30  ;;  %v970_v36 = vand.u32 2147483647, %v944_v30  ;;  %vm966_vm9 = vweird.f32 %v944_v30 }
 0x36f   :  { %v958_v8 = vor.u32 1.1754944e-38, %v957_v33  ;;  %vm956_vm12 = vcmp.eq.f32.partialorder %v955_v26, 8.507059e+37 }
 0x370   :  { %vm971_vm13 = vcmp.eq.f32.partialorder %v970_v36, 8.507059e+37  ;;  %v3302_v36 = vld [vmem:[#allocation20_spill] sm:$0xff] }
 0x371   :  { %v1981_v28 = vpop.eup %1980 }
 0x372   :  { %v945_v11 = vadd.f32 1.0, %v1981_v28 }
 0x373   :  { %v1983_v15 = vpop.eup %1982 }
 0x374   :  { %v1985_v13 = vpop.eup %1984  ;;  %v947_v5 = vmul.f32 %v1983_v15, %v943_v31  ;;  %1986 = vrcp.f32 %v945_v11  ;;  %vm952_vm6 = vweird.f32 %v1983_v15  ;;  %vm981_vm0 = vweird.f32 %v945_v11 }
 0x375   :  { %v962_v34 = vmul.f32 %v1985_v13, %v944_v30  ;;  %1988 = vtanh.f32 %v912_v22  ;;  %vm967_vm7 = vweird.f32 %v1985_v13  ;;  %vm953_vm10 = vmor %vm951_vm8, %vm952_vm6 }
 0x376   :  { %v948_v24 = vsub.f32 1.0, %v947_v5  ;;  %vm968_vm11 = vmor %vm966_vm9, %vm967_vm7  ;;  %v973_v5 = vor.u32 1.1754944e-38, %v972_v39  ;;  %v3301_v39 = vld [vmem:[#allocation21_spill] sm:$0xff] }
 0x377   :  { %v963_v0 = vsub.f32 1.0, %v962_v34 }
 0x378   :  { %v949_v16 = vmul.f32 %v1983_v15, %v948_v24 }
 0x379   :  { %v964_v63 = vmul.f32 %v1985_v13, %v963_v0 }
 0x37a   :  { %v1987_v14 = vpop.eup %1986  ;;  %v950_v28 = vadd.f32 %v1983_v15, %v949_v16 }
 0x37b   :  { %v965_v3 = vadd.f32 %v1985_v13, %v964_v63  ;;  %v977_v55 = vmul.f32 %v1987_v14, %v945_v11  ;;  %v1989_v22 = vpop.eup %1988  ;;  %vm982_vm15 = vweird.f32 %v1987_v14  ;;  %v987_v63 = vand.u32 2147483648, %v945_v11 }
 0x37c   :  { %v954_v34 = vsel %vm953_vm10, %v1983_v15, %v950_v28  ;;  %v985_v15 = vand.u32 2147483647, %v945_v11  ;;  %vm983_vm1 = vmor %vm981_vm0, %vm982_vm15  ;;  %v3300_v11 = vld [vmem:[#allocation11_spill] sm:$0xff] }
 0x37d   :  { %v959_v20 = vsel %vm956_vm12, %v958_v8, %v954_v34  ;;  %v969_v24 = vsel %vm968_vm11, %v1985_v13, %v965_v3  ;;  %v978_v60 = vsub.f32 1.0, %v977_v55  ;;  %v988_v33 = vor.u32 1.1754944e-38, %v987_v63  ;;  %v3303_v28 = vld [vmem:[#allocation19_spill] sm:$0xff]  ;;  %v3305_v34 = vld [vmem:[#allocation24_spill] sm:$0xff] }
 0x37e   :  { %v974_v0 = vsel %vm971_vm13, %v973_v5, %v969_v24  ;;  %v993_v29 = vmul.f32 %v1989_v22, %v959_v20  ;;  %vm986_vm2 = vcmp.eq.f32.partialorder %v985_v15, 8.507059e+37  ;;  %v3298_v20 = vld [vmem:[#allocation12_spill] sm:$0xff]  ;;  %v3304_v8 = vld [vmem:[#allocation15_spill] sm:$0xff]  ;;  %v1002_v22 = vrot.slane %v3305_v34, 2 }
 0x37f   :  { %v992_v35 = vmul.f32 %v974_v0, %v2843_v32  ;;  %v979_v16 = vmul.f32 %v1987_v14, %v978_v60  ;;  %v3295_v60 = vld [vmem:[#allocation17_spill] sm:$0xff]  ;;  %v3296_v32 = vld [vmem:[#allocation16_spill] sm:$0xff]  ;;  %v1001_v5 = vrot.slane %v3304_v8, 2 }
 0x381   :  { %v2935_v31 = vadd.f32 %v993_v29, %v992_v35  ;;  %v980_v30 = vadd.f32 %v1987_v14, %v979_v16  ;;  %v3294_v29 = vld [vmem:[#allocation18_spill] sm:$0xff] }
 0x382   :  { %v3297_v35 = vld [vmem:[#allocation14_spill] sm:$0xff] }
 0x383   :  { %1990 = vtanh.f32 %v2935_v31  ;;  %v984_v26 = vsel %vm983_vm1, %v1987_v14, %v980_v30  ;;  %v3299_v14 = vld [vmem:[#allocation13_spill] sm:$0xff] }
 0x384   :  { %v989_v55 = vsel %vm986_vm2, %v988_v33, %v984_v26  ;;  %v3306_v26 = vld [vmem:[#allocation30_spill] sm:$0xff] }
 0x385   :  { %v1004_v33 = vrot.slane %v3306_v26, 2 }
 0x389   :  { %v1991_v13 = vpop.eup %1990 }
 0x38a   :  { %v996_v3 = vmul.f32 %v1991_v13, %v989_v55 }
 0x38c   :  { %1869 = vmatmul.msk.f32.vlgmr.msrb.gmra.mxu0 %vm234_vm14, %v996_v3  ;;  %1870 = vmatmul.msk.f32.vlgmr.msrb.gmra.mxu1 %vm234_vm14, %v996_v3 }
 0x38d   :  { %1871 = vmatmul.msk.f32.vlgmr.msra.gmra.mxu2 %vm234_vm14, %v996_v3  ;;  %1872 = vmatmul.msk.f32.vlgmr.msra.gmra.mxu3 %vm234_vm14, %v996_v3 }
 0x38e   :  { %1324 = vmatpush.msrb.mxu0 %v2710_v4  ;;  %1344 = vmatpush.msrb.mxu1 %v2713_v37 }
 0x38f   :  { %1364 = vmatpush.msra.mxu2 %v2716_v38  ;;  %1384 = vmatpush.msra.mxu3 %v2719_v41 }
 0x390   :  { %1325 = vmatpush.msrb.mxu0 %v2722_v42  ;;  %1345 = vmatpush.msrb.mxu1 %v2725_v43 }
 0x391   :  { %1365 = vmatpush.msra.mxu2 %v2728_v45  ;;  %1385 = vmatpush.msra.mxu3 %v2731_v46 }
 0x392   :  { %1326 = vmatpush.msrb.mxu0 %v2734_v47  ;;  %1346 = vmatpush.msrb.mxu1 %v2737_v48 }
 0x393   :  { %1366 = vmatpush.msra.mxu2 %v2740_v50  ;;  %1386 = vmatpush.msra.mxu3 %v2743_v52 }
 0x394   :  { %1327 = vmatpush.msrb.mxu0 %v2746_v53  ;;  %1347 = vmatpush.msrb.mxu1 %v2749_v56 }
 0x395   :  { %1367 = vmatpush.msra.mxu2 %v2752_v59  ;;  %1387 = vmatpush.msra.mxu3 %v2755_v62 }
 0x396   :  { %1328 = vmatpush.msrb.mxu0 %v2758_v44  ;;  %1348 = vmatpush.msrb.mxu1 %v2761_v61 }
 0x397   :  { %1368 = vmatpush.msra.mxu2 %v2764_v12  ;;  %1388 = vmatpush.msra.mxu3 %v2767_v7 }
 0x398   :  { %1329 = vmatpush.msrb.mxu0 %v2770_v1  ;;  %1349 = vmatpush.msrb.mxu1 %v2773_v9 }
 0x399   :  { %1369 = vmatpush.msra.mxu2 %v2776_v10  ;;  %1389 = vmatpush.msra.mxu3 %v2779_v25 }
 0x39a   :  { %1330 = vmatpush.msrb.mxu0 %v2782_v54  ;;  %1350 = vmatpush.msrb.mxu1 %v2785_v23 }
 0x39b   :  { %1370 = vmatpush.msra.mxu2 %v2788_v40  ;;  %1390 = vmatpush.msra.mxu3 %v2791_v17 }
 0x39c   :  { %1331 = vmatpush.msrb.mxu0 %v2794_v6  ;;  %1351 = vmatpush.msrb.mxu1 %v2879_v18 }
 0x39d   :  { %1371 = vmatpush.msra.mxu2 %v2798_v49  ;;  %1391 = vmatpush.msra.mxu3 %v2801_v51 }
 0x39e   :  { %1332 = vmatpush.msrb.mxu0 %v2804_v57  ;;  %1352 = vmatpush.msrb.mxu1 %v2885_v27 }
 0x39f   :  { %1372 = vmatpush.msra.mxu2 %v2808_v19  ;;  %1392 = vmatpush.msra.mxu3 %v2811_v21 }
 0x3a0   :  { %1333 = vmatpush.msrb.mxu0 %v2814_v58  ;;  %1353 = vmatpush.msrb.mxu1 %v2891_v2 }
 0x3a1   :  { %1373 = vmatpush.msra.mxu2 %v3294_v29  ;;  %1393 = vmatpush.msra.mxu3 %v3295_v60 }
 0x3a2   :  { %1334 = vmatpush.msrb.mxu0 %v3296_v32  ;;  %1354 = vmatpush.msrb.mxu1 %v3297_v35 }
 0x3a3   :  { %1374 = vmatpush.msra.mxu2 %v3298_v20  ;;  %1394 = vmatpush.msra.mxu3 %v3299_v14 }
 0x3a4   :  { %1335 = vmatpush.msrb.mxu0 %v3300_v11  ;;  %1355 = vmatpush.msrb.mxu1 %v3301_v39 }
 0x3a5   :  { %1375 = vmatpush.msra.mxu2 %v3302_v36  ;;  %1395 = vmatpush.msra.mxu3 %v3303_v28 }
 0x409   :  { %v1029_v24 = vpop.f32.mrf.mxu0  ;;  %v1049_v0 = vpop.f32.mrf.mxu1 }
 0x40a   :  { %v1030_v16 = vadd.f32 %v1029_v24, %v1001_v5  ;;  %v1050_v30 = vadd.f32 %v1049_v0, %v1002_v22  ;;  %v3307_v5 = vld [vmem:[#allocation28_spill] sm:$0xff] }
 0x40b   :  { %v1003_v22 = vrot.slane %v3307_v5, 2 }
 0x40c   :  { %v1873_v63 = vmul.f32 -1.442695, %v1030_v16  ;;  %v1874_v15 = vmul.f32 -1.442695, %v1050_v30 }
 0x40e   :  { %1992 = vpow2.f32 %v1873_v63 }
 0x40f   :  { %1994 = vpow2.f32 %v1874_v15 }
 0x410   :  { %v1089_v13 = vpop.f32.mrf.mxu3  ;;  %v1069_v34 = vpop.f32.mrf.mxu2 }
 0x411   :  { %v1090_v55 = vadd.f32 %v1089_v13, %v1004_v33  ;;  %v1070_v16 = vadd.f32 %v1069_v34, %v1003_v22 }
 0x413   :  { %v1875_v3 = vmul.f32 -1.442695, %v1090_v55 }
 0x414   :  { %v1993_v36 = vpop.eup %1992 }
 0x415   :  { %v1995_v39 = vpop.eup %1994  ;;  %v1101_v28 = vadd.f32 1.0, %v1993_v36  ;;  %1996 = vpow2.f32 %v1875_v3 }
 0x416   :  { %v1102_v8 = vadd.f32 1.0, %v1995_v39 }
 0x417   :  { %1998 = vrcp.f32 %v1101_v28  ;;  %v1115_v55 = vand.u32 2147483648, %v1101_v28  ;;  %v1113_v39 = vand.u32 2147483647, %v1101_v28  ;;  %vm1109_vm5 = vweird.f32 %v1101_v28 }
 0x418   :  { %2000 = vrcp.f32 %v1102_v8  ;;  %v1130_v36 = vand.u32 2147483648, %v1102_v8  ;;  %v1128_v14 = vand.u32 2147483647, %v1102_v8  ;;  %vm1124_vm6 = vweird.f32 %v1102_v8 }
 0x419   :  { %vm1114_vm9 = vcmp.eq.f32.partialorder %v1113_v39, 8.507059e+37 }
 0x41a   :  { %vm1129_vm10 = vcmp.eq.f32.partialorder %v1128_v14, 8.507059e+37 }
 0x41b   :  { %v1997_v11 = vpop.eup %1996 }
 0x41c   :  { %v1103_v24 = vadd.f32 1.0, %v1997_v11  ;;  %v1116_v11 = vor.u32 1.1754944e-38, %v1115_v55 }
 0x41d   :  { %v1999_v0 = vpop.eup %1998 }
 0x41e   :  { %v2001_v30 = vpop.eup %2000  ;;  %v1105_v63 = vmul.f32 %v1999_v0, %v1101_v28  ;;  %2002 = vrcp.f32 %v1103_v24  ;;  %vm1110_vm3 = vweird.f32 %v1999_v0  ;;  %vm1139_vm12 = vweird.f32 %v1103_v24 }
 0x41f   :  { %v1120_v15 = vmul.f32 %v2001_v30, %v1102_v8  ;;  %2004 = vtanh.f32 %v1070_v16  ;;  %vm1125_vm4 = vweird.f32 %v2001_v30  ;;  %vm1111_vm7 = vmor %vm1109_vm5, %vm1110_vm3 }
 0x420   :  { %v1106_v33 = vsub.f32 1.0, %v1105_v63  ;;  %vm1126_vm8 = vmor %vm1124_vm6, %vm1125_vm4  ;;  %v1131_v63 = vor.u32 1.1754944e-38, %v1130_v36 }
 0x421   :  { %v1121_v13 = vsub.f32 1.0, %v1120_v15 }
 0x422   :  { %v1107_v3 = vmul.f32 %v1999_v0, %v1106_v33 }
 0x423   :  { %v1122_v26 = vmul.f32 %v2001_v30, %v1121_v13 }
 0x424   :  { %v2003_v20 = vpop.eup %2002  ;;  %v1108_v5 = vadd.f32 %v1999_v0, %v1107_v3 }
 0x425   :  { %v1123_v34 = vadd.f32 %v2001_v30, %v1122_v26  ;;  %v1135_v22 = vmul.f32 %v2003_v20, %v1103_v24  ;;  %v2005_v16 = vpop.eup %2004  ;;  %vm1140_vm11 = vweird.f32 %v2003_v20  ;;  %v1145_v26 = vand.u32 2147483648, %v1103_v24 }
 0x426   :  { %v1112_v15 = vsel %vm1111_vm7, %v1999_v0, %v1108_v5  ;;  %v1143_v5 = vand.u32 2147483647, %v1103_v24  ;;  %vm1141_vm13 = vmor %vm1139_vm12, %vm1140_vm11 }
 0x427   :  { %v1117_v35 = vsel %vm1114_vm9, %v1116_v11, %v1112_v15  ;;  %v1127_v33 = vsel %vm1126_vm8, %v2001_v30, %v1123_v34  ;;  %v1136_v32 = vsub.f32 1.0, %v1135_v22  ;;  %v1146_v55 = vor.u32 1.1754944e-38, %v1145_v26 }
 0x428   :  { %v1132_v13 = vsel %vm1129_vm10, %v1131_v63, %v1127_v33  ;;  %v1151_v60 = vmul.f32 %v2005_v16, %v1117_v35  ;;  %vm1144_vm15 = vcmp.eq.f32.partialorder %v1143_v5, 8.507059e+37 }
 0x429   :  { %v1150_v29 = vmul.f32 %v1132_v13, %v2935_v31  ;;  %v1137_v3 = vmul.f32 %v2003_v20, %v1136_v32 }
 0x42b   :  { %v2995_v28 = vadd.f32 %v1151_v60, %v1150_v29  ;;  %v1138_v8 = vadd.f32 %v2003_v20, %v1137_v3 }
 0x42d   :  { %2006 = vtanh.f32 %v2995_v28  ;;  %v1142_v0 = vsel %vm1141_vm13, %v2003_v20, %v1138_v8 }
 0x42e   :  { %v1147_v30 = vsel %vm1144_vm15, %v1146_v55, %v1142_v0 }
 0x433   :  { %v2007_v14 = vpop.eup %2006 }
 0x434   :  { %v1154_v36 = vmul.f32 %v2007_v14, %v1147_v30 }
 0x436   :  { %1876 = vmatmul.msk.f32.vlgmr.msra.gmra.mxu0 %vm234_vm14, %v1154_v36  ;;  %1877 = vmatmul.msk.f32.vlgmr.msra.gmra.mxu1 %vm234_vm14, %v1154_v36 }
 0x437   :  { %1878 = vmatmul.msk.f32.vlgmr.msrb.gmra.mxu2 %vm234_vm14, %v1154_v36  ;;  %1879 = vmatmul.msk.f32.vlgmr.msrb.gmra.mxu3 %vm234_vm14, %v1154_v36 }
 0x438   :  { %1470 = vmatpush.msra.mxu0 %v2710_v4  ;;  %1490 = vmatpush.msra.mxu1 %v2713_v37  ;;  %v3308_v4 = vld [vmem:[#allocation18_spill] sm:$0xff]  ;;  %v3309_v37 = vld [vmem:[#allocation17_spill] sm:$0xff] }
 0x439   :  { %1510 = vmatpush.msrb.mxu2 %v2716_v38  ;;  %1530 = vmatpush.msrb.mxu3 %v2719_v41  ;;  %v3310_v38 = vld [vmem:[#allocation16_spill] sm:$0xff]  ;;  %v3311_v41 = vld [vmem:[#allocation14_spill] sm:$0xff] }
 0x43a   :  { %1471 = vmatpush.msra.mxu0 %v2722_v42  ;;  %1491 = vmatpush.msra.mxu1 %v2725_v43  ;;  %v3312_v42 = vld [vmem:[#allocation12_spill] sm:$0xff]  ;;  %v3313_v43 = vld [vmem:[#allocation13_spill] sm:$0xff] }
 0x43b   :  { %1511 = vmatpush.msrb.mxu2 %v2728_v45  ;;  %1531 = vmatpush.msrb.mxu3 %v2731_v46  ;;  %v3314_v45 = vld [vmem:[#allocation11_spill] sm:$0xff]  ;;  %v3315_v46 = vld [vmem:[#allocation21_spill] sm:$0xff] }
 0x43c   :  { %1472 = vmatpush.msra.mxu0 %v2734_v47  ;;  %1492 = vmatpush.msra.mxu1 %v2737_v48  ;;  %v3316_v47 = vld [vmem:[#allocation20_spill] sm:$0xff]  ;;  %v3317_v48 = vld [vmem:[#allocation19_spill] sm:$0xff] }
 0x43d   :  { %1512 = vmatpush.msrb.mxu2 %v2740_v50  ;;  %1532 = vmatpush.msrb.mxu3 %v2743_v52  ;;  %v3318_v50 = vld [vmem:[#allocation15_spill] sm:$0xff] }
 0x43e   :  { %1473 = vmatpush.msra.mxu0 %v2746_v53  ;;  %1493 = vmatpush.msra.mxu1 %v2749_v56  ;;  %v1155_v52 = vrot.slane %v3318_v50, 4  ;;  %v3319_v53 = vld [vmem:[#allocation24_spill] sm:$0xff] }
 0x43f   :  { %1513 = vmatpush.msrb.mxu2 %v2752_v59  ;;  %1533 = vmatpush.msrb.mxu3 %v2755_v62  ;;  %v1156_v56 = vrot.slane %v3319_v53, 4 }
 0x440   :  { %1474 = vmatpush.msra.mxu0 %v2758_v44  ;;  %1494 = vmatpush.msra.mxu1 %v2761_v61 }
 0x441   :  { %1514 = vmatpush.msrb.mxu2 %v2764_v12  ;;  %1534 = vmatpush.msrb.mxu3 %v2767_v7 }
 0x442   :  { %1475 = vmatpush.msra.mxu0 %v2770_v1  ;;  %1495 = vmatpush.msra.mxu1 %v2773_v9  ;;  %v3320_v1 = vld [vmem:[#allocation30_spill] sm:$0xff] }
 0x443   :  { %1515 = vmatpush.msrb.mxu2 %v2776_v10  ;;  %1535 = vmatpush.msrb.mxu3 %v2779_v25  ;;  %v1158_v9 = vrot.slane %v3320_v1, 4 }
 0x444   :  { %1476 = vmatpush.msra.mxu0 %v2782_v54  ;;  %1496 = vmatpush.msra.mxu1 %v2785_v23 }
 0x445   :  { %1516 = vmatpush.msrb.mxu2 %v2788_v40  ;;  %1536 = vmatpush.msrb.mxu3 %v2791_v17 }
 0x446   :  { %1477 = vmatpush.msra.mxu0 %v2794_v6  ;;  %1497 = vmatpush.msra.mxu1 %v2879_v18 }
 0x447   :  { %1517 = vmatpush.msrb.mxu2 %v2798_v49  ;;  %1537 = vmatpush.msrb.mxu3 %v2801_v51 }
 0x448   :  { %1478 = vmatpush.msra.mxu0 %v2804_v57  ;;  %1498 = vmatpush.msra.mxu1 %v2885_v27  ;;  %v3321_v57 = vld [vmem:[#allocation28_spill] sm:$0xff] }
 0x449   :  { %1518 = vmatpush.msrb.mxu2 %v2808_v19  ;;  %1538 = vmatpush.msrb.mxu3 %v2811_v21  ;;  %v1157_v19 = vrot.slane %v3321_v57, 4 }
 0x44a   :  { %1479 = vmatpush.msra.mxu0 %v2814_v58  ;;  %1499 = vmatpush.msra.mxu1 %v2891_v2 }
 0x44b   :  { %1519 = vmatpush.msrb.mxu2 %v3308_v4  ;;  %1539 = vmatpush.msrb.mxu3 %v3309_v37 }
 0x44c   :  { %1480 = vmatpush.msra.mxu0 %v3310_v38  ;;  %1500 = vmatpush.msra.mxu1 %v3311_v41 }
 0x44d   :  { %1520 = vmatpush.msrb.mxu2 %v3312_v42  ;;  %1540 = vmatpush.msrb.mxu3 %v3313_v43 }
 0x44e   :  { %1481 = vmatpush.msra.mxu0 %v3314_v45  ;;  %1501 = vmatpush.msra.mxu1 %v3315_v46 }
 0x44f   :  { %1521 = vmatpush.msrb.mxu2 %v3316_v47  ;;  %1541 = vmatpush.msrb.mxu3 %v3317_v48 }
 0x4b3   :  { %v1183_v59 = vpop.f32.mrf.mxu0  ;;  %v1203_v62 = vpop.f32.mrf.mxu1 }
 0x4b4   :  { %v1184_v44 = vadd.f32 %v1183_v59, %v1155_v52  ;;  %v1204_v61 = vadd.f32 %v1203_v62, %v1156_v56 }
 0x4b6   :  { %v1880_v12 = vmul.f32 -1.442695, %v1184_v44  ;;  %v1881_v7 = vmul.f32 -1.442695, %v1204_v61 }
 0x4b8   :  { %2008 = vpow2.f32 %v1880_v12  ;;  %v2123_v12 = vld [vmem:[#allocation2 + $0x168] sm:$0xff] }
 0x4b9   :  { %2010 = vpow2.f32 %v1881_v7  ;;  %v2124_v7 = vld [vmem:[#allocation2 + $0x170] sm:$0xff] }
 0x4ba   :  { %v1243_v10 = vpop.f32.mrf.mxu3  ;;  %v1223_v49 = vpop.f32.mrf.mxu2 }
 0x4bb   :  { %v1244_v25 = vadd.f32 %v1243_v10, %v1158_v9  ;;  %v1224_v31 = vadd.f32 %v1223_v49, %v1157_v19  ;;  %v2125_v9 = vld [vmem:[#allocation2 + $0x178] sm:$0xff]  ;;  %v2126_v10 = vld [vmem:[#allocation2 + $0x140] sm:$0xff]  ;;  %v2135_v19 = vld [vmem:[#allocation2 + $0x108] sm:$0xff] }
 0x4bc   :  { %v2133_v49 = vld [vmem:[#allocation2 + $0x138] sm:$0xff] }
 0x4bd   :  { %v1882_v54 = vmul.f32 -1.442695, %v1244_v25  ;;  %v2127_v25 = vld [vmem:[#allocation2 + $0x148] sm:$0xff] }
 0x4be   :  { %v2009_v23 = vpop.eup %2008 }
 0x4bf   :  { %v2011_v40 = vpop.eup %2010  ;;  %v1255_v17 = vadd.f32 1.0, %v2009_v23  ;;  %2012 = vpow2.f32 %v1882_v54  ;;  %v2128_v54 = vld [vmem:[#allocation2 + $0x150] sm:$0xff]  ;;  %v2129_v23 = vld [vmem:[#allocation2 + $0x158] sm:$0xff] }
 0x4c0   :  { %v1256_v6 = vadd.f32 1.0, %v2011_v40  ;;  %v2130_v40 = vld [vmem:[#allocation2 + $0x120] sm:$0xff] }
 0x4c1   :  { %2014 = vrcp.f32 %v1255_v17  ;;  %v1269_v24 = vand.u32 2147483648, %v1255_v17  ;;  %v1267_v34 = vand.u32 2147483647, %v1255_v17  ;;  %vm1263_vm2 = vweird.f32 %v1255_v17 }
 0x4c2   :  { %2016 = vrcp.f32 %v1256_v6  ;;  %v1284_v39 = vand.u32 2147483648, %v1256_v6  ;;  %v1282_v63 = vand.u32 2147483647, %v1256_v6  ;;  %vm1278_vm3 = vweird.f32 %v1256_v6 }
 0x4c3   :  { %v1270_v33 = vor.u32 1.1754944e-38, %v1269_v24  ;;  %vm1268_vm6 = vcmp.eq.f32.partialorder %v1267_v34, 8.507059e+37  ;;  %v2144_v24 = vld [vmem:[#allocation2 + $0xd0] sm:$0xff]  ;;  %v2147_v34 = vld [vmem:[#allocation2 + $0xa8] sm:$0xff] }
 0x4c4   :  { %v1285_v8 = vor.u32 1.1754944e-38, %v1284_v39  ;;  %vm1283_vm7 = vcmp.eq.f32.partialorder %v1282_v63, 8.507059e+37  ;;  %v2145_v39 = vld [vmem:[#allocation2 + $0xd8] sm:$0xff] }
 0x4c5   :  { %v2013_v51 = vpop.eup %2012  ;;  %v2149_v63 = vld [vmem:[#allocation2 + $0xb8] sm:$0xff] }
 0x4c6   :  { %v1257_v21 = vadd.f32 1.0, %v2013_v51  ;;  %v2134_v51 = vld [vmem:[#allocation2 + $0x100] sm:$0xff] }
 0x4c7   :  { %v2015_v58 = vpop.eup %2014 }
 0x4c8   :  { %v2017_v29 = vpop.eup %2016  ;;  %v1259_v60 = vmul.f32 %v2015_v58, %v1255_v17  ;;  %2018 = vrcp.f32 %v1257_v21  ;;  %vm1264_vm0 = vweird.f32 %v2015_v58  ;;  %v1299_v48 = vand.u32 2147483648, %v1257_v21  ;;  %v2131_v17 = vld [vmem:[#allocation2 + $0x128] sm:$0xff] }
 0x4c9   :  { %v1274_v32 = vmul.f32 %v2017_v29, %v1256_v6  ;;  %2020 = vtanh.f32 %v1224_v31  ;;  %vm1279_vm1 = vweird.f32 %v2017_v29  ;;  %vm1265_vm4 = vmor %vm1263_vm2, %vm1264_vm0  ;;  %vm1293_vm9 = vweird.f32 %v1257_v21  ;;  %v2132_v6 = vld [vmem:[#allocation2 + $0x130] sm:$0xff]  ;;  %v2138_v31 = vld [vmem:[#allocation2 + $0xe0] sm:$0xff] }
 0x4ca   :  { %v1260_v35 = vsub.f32 1.0, %v1259_v60  ;;  %vm1280_vm5 = vmor %vm1278_vm3, %vm1279_vm1  ;;  %v1297_v52 = vand.u32 2147483647, %v1257_v21  ;;  %v1300_v59 = vor.u32 1.1754944e-38, %v1299_v48  ;;  %v2140_v60 = vld [vmem:[#allocation2 + $0xf0] sm:$0xff] }
 0x4cb   :  { %v1275_v20 = vsub.f32 1.0, %v1274_v32  ;;  %v2141_v32 = vld [vmem:[#allocation2 + $0xf8] sm:$0xff] }
 0x4cc   :  { %v1261_v11 = vmul.f32 %v2015_v58, %v1260_v35  ;;  %vm1298_vm11 = vcmp.eq.f32.partialorder %v1297_v52, 8.507059e+37  ;;  %v2142_v35 = vld [vmem:[#allocation2 + $0xc0] sm:$0xff] }
 0x4cd   :  { %v1276_v22 = vmul.f32 %v2017_v29, %v1275_v20  ;;  %v2143_v20 = vld [vmem:[#allocation2 + $0xc8] sm:$0xff] }
 0x4ce   :  { %v2019_v15 = vpop.eup %2018  ;;  %v1262_v16 = vadd.f32 %v2015_v58, %v1261_v11  ;;  %v2146_v11 = vld [vmem:[#allocation2 + $0xa0] sm:$0xff] }
 0x4cf   :  { %v1277_v13 = vadd.f32 %v2017_v29, %v1276_v22  ;;  %v1289_v3 = vmul.f32 %v2019_v15, %v1257_v21  ;;  %v2021_v5 = vpop.eup %2020  ;;  %vm1294_vm8 = vweird.f32 %v2019_v15  ;;  %v2136_v21 = vld [vmem:[#allocation2 + $0x110] sm:$0xff] }
 0x4d0   :  { %v1266_v26 = vsel %vm1265_vm4, %v2015_v58, %v1262_v16  ;;  %vm1295_vm10 = vmor %vm1293_vm9, %vm1294_vm8  ;;  %v2137_v58 = vld [vmem:[#allocation2 + $0x118] sm:$0xff]  ;;  %v2148_v22 = vld [vmem:[#allocation2 + $0xb0] sm:$0xff] }
 0x4d1   :  { %v1271_v0 = vsel %vm1268_vm6, %v1270_v33, %v1266_v26  ;;  %v1281_v55 = vsel %vm1280_vm5, %v2017_v29, %v1277_v13  ;;  %v1290_v14 = vsub.f32 1.0, %v1289_v3  ;;  %v2139_v29 = vld [vmem:[#allocation2 + $0xe8] sm:$0xff]  ;;  %v2151_v16 = vld [vmem:[#allocation2 + $0x90] sm:$0xff]  ;;  %v2152_v33 = vld [vmem:[#allocation2 + $0x98] sm:$0xff] }
 0x4d2   :  { %v1286_v30 = vsel %vm1283_vm7, %v1285_v8, %v1281_v55  ;;  %v1305_v36 = vmul.f32 %v2021_v5, %v1271_v0  ;;  %v2153_v13 = vld [vmem:[#allocation2 + $0x60] sm:$0xff]  ;;  %v2154_v3 = vld [vmem:[#allocation2 + $0x70] sm:$0xff]  ;;  %v2155_v8 = vld [vmem:[#allocation2 + $0x78] sm:$0xff] }
 0x4d3   :  { %v1304_v37 = vmul.f32 %v1286_v30, %v2995_v28  ;;  %v1291_v38 = vmul.f32 %v2019_v15, %v1290_v14  ;;  %v2122_v28 = vld [vmem:[#allocation2 + $0x160] sm:$0xff]  ;;  %v2157_v5 = vld [vmem:[#allocation2 + $0x58] sm:$0xff] }
 0x4d4   :  { %v2156_v26 = vld [vmem:[#allocation2 + $0x40] sm:$0xff]  ;;  %v2159_v0 = vld [vmem:[#allocation2 + $0x38] sm:$0xff] }
 0x4d5   :  { %v3055_v43 = vadd.f32 %v1305_v36, %v1304_v37  ;;  %v1292_v45 = vadd.f32 %v2019_v15, %v1291_v38  ;;  %v2161_v55 = vld [vmem:[#allocation2 + $0x18] sm:$0xff]  ;;  %v1312_v38 = vrot.slane %v3320_v1, 6 }
 0x4d7   :  { %2022 = vtanh.f32 %v3055_v43  ;;  %v1296_v56 = vsel %vm1295_vm10, %v2019_v15, %v1292_v45  ;;  %v2150_v15 = vld [vmem:[#allocation2 + $0x80] sm:$0xff] }
 0x4d8   :  { %v1301_v44 = vsel %vm1298_vm11, %v1300_v59, %v1296_v56 }
 0x4dd   :  { %v2023_v62 = vpop.eup %2022 }
 0x4de   :  { %v1308_v61 = vmul.f32 %v2023_v62, %v1301_v44  ;;  %v1311_v62 = vrot.slane %v3321_v57, 6 }
 0x4e0   :  { %1883 = vmatmul.msk.f32.vlgmr.msrb.gmra.mxu0 %vm234_vm14, %v1308_v61  ;;  %1884 = vmatmul.msk.f32.vlgmr.msrb.gmra.mxu1 %vm234_vm14, %v1308_v61 }
 0x4e1   :  { %1885 = vmatmul.msk.f32.vlgmr.msra.gmra.mxu2 %vm234_vm14, %v1308_v61  ;;  %1886 = vmatmul.msk.f32.vlgmr.msra.gmra.mxu3 %vm234_vm14, %v1308_v61 }
 0x4e2   :  { %1616 = vmatpush.msrb.mxu0 %v2122_v28  ;;  %1636 = vmatpush.msrb.mxu1 %v2123_v12 }
 0x4e3   :  { %1656 = vmatpush.msra.mxu2 %v2124_v7  ;;  %1676 = vmatpush.msra.mxu3 %v2125_v9 }
 0x4e4   :  { %1617 = vmatpush.msrb.mxu0 %v2126_v10  ;;  %1637 = vmatpush.msrb.mxu1 %v2127_v25 }
 0x4e5   :  { %1657 = vmatpush.msra.mxu2 %v2128_v54  ;;  %1677 = vmatpush.msra.mxu3 %v2129_v23 }
 0x4e6   :  { %1618 = vmatpush.msrb.mxu0 %v2130_v40  ;;  %1638 = vmatpush.msrb.mxu1 %v2131_v17 }
 0x4e7   :  { %1658 = vmatpush.msra.mxu2 %v2132_v6  ;;  %1678 = vmatpush.msra.mxu3 %v2133_v49 }
 0x4e8   :  { %1619 = vmatpush.msrb.mxu0 %v2134_v51  ;;  %1639 = vmatpush.msrb.mxu1 %v2135_v19 }
 0x4e9   :  { %1659 = vmatpush.msra.mxu2 %v2136_v21  ;;  %1679 = vmatpush.msra.mxu3 %v2137_v58 }
 0x4ea   :  { %1620 = vmatpush.msrb.mxu0 %v2138_v31  ;;  %1640 = vmatpush.msrb.mxu1 %v2139_v29 }
 0x4eb   :  { %1660 = vmatpush.msra.mxu2 %v2140_v60  ;;  %1680 = vmatpush.msra.mxu3 %v2141_v32 }
 0x4ec   :  { %1621 = vmatpush.msrb.mxu0 %v2142_v35  ;;  %1641 = vmatpush.msrb.mxu1 %v2143_v20 }
 0x4ed   :  { %1661 = vmatpush.msra.mxu2 %v2144_v24  ;;  %1681 = vmatpush.msra.mxu3 %v2145_v39 }
 0x4ee   :  { %1622 = vmatpush.msrb.mxu0 %v2146_v11  ;;  %1642 = vmatpush.msrb.mxu1 %v2147_v34 }
 0x4ef   :  { %1662 = vmatpush.msra.mxu2 %v2148_v22  ;;  %1682 = vmatpush.msra.mxu3 %v2149_v63 }
 0x4f0   :  { %1623 = vmatpush.msrb.mxu0 %v2150_v15  ;;  %1643 = vmatpush.msrb.mxu1 %v2879_v18  ;;  %v2158_v18 = vld [vmem:[#allocation2 + $0x20] sm:$0xff] }
 0x4f1   :  { %1663 = vmatpush.msra.mxu2 %v2151_v16  ;;  %1683 = vmatpush.msra.mxu3 %v2152_v33 }
 0x4f2   :  { %1624 = vmatpush.msrb.mxu0 %v2153_v13  ;;  %1644 = vmatpush.msrb.mxu1 %v2885_v27  ;;  %v2160_v27 = vld [vmem:[#allocation2] sm:$0xff] }
 0x4f3   :  { %1664 = vmatpush.msra.mxu2 %v2154_v3  ;;  %1684 = vmatpush.msra.mxu3 %v2155_v8 }
 0x4f4   :  { %1625 = vmatpush.msrb.mxu0 %v2156_v26  ;;  %1645 = vmatpush.msrb.mxu1 %v2891_v2  ;;  %v1309_v2 = vrot.slane %v3318_v50, 6 }
 0x4f5   :  { %1665 = vmatpush.msra.mxu2 %v3308_v4  ;;  %1685 = vmatpush.msra.mxu3 %v2157_v5  ;;  %v1310_v4 = vrot.slane %v3319_v53, 6  ;;  %v3322_v5 = vld [vmem:[#allocation23_spill] sm:$0xff] }
 0x4f6   :  { %1626 = vmatpush.msrb.mxu0 %v2158_v18  ;;  %1646 = vmatpush.msrb.mxu1 %v3311_v41 }
 0x4f7   :  { %1666 = vmatpush.msra.mxu2 %v3312_v42  ;;  %1686 = vmatpush.msra.mxu3 %v2159_v0  ;;  %v3323_v0 = vld [vmem:[#allocation29_spill] sm:$0xff] }
 0x4f8   :  { %1627 = vmatpush.msrb.mxu0 %v2160_v27  ;;  %1647 = vmatpush.msrb.mxu1 %v3315_v46 }
 0x4f9   :  { %1667 = vmatpush.msra.mxu2 %v3316_v47  ;;  %1687 = vmatpush.msra.mxu3 %v2161_v55 }
 0x55d   :  { %v1337_v14 = vpop.f32.mrf.mxu0  ;;  %v1357_v30 = vpop.f32.mrf.mxu1 }
 0x55e   :  { %v1338_v36 = vadd.f32 %v1337_v14, %v1309_v2  ;;  %v1358_v41 = vadd.f32 %v1357_v30, %v1310_v4  ;;  %v3324_v14 = vld [vmem:[#allocation26_spill] sm:$0xff] }
 0x560   :  { %v1887_v37 = vmul.f32 -1.442695, %v1338_v36  ;;  %v1888_v42 = vmul.f32 -1.442695, %v1358_v41 }
 0x562   :  { %2024 = vpow2.f32 %v1887_v37 }
 0x563   :  { %2026 = vpow2.f32 %v1888_v42 }
 0x564   :  { %v1397_v45 = vpop.f32.mrf.mxu3  ;;  %v1377_v53 = vpop.f32.mrf.mxu2 }
 0x565   :  { %v1398_v46 = vadd.f32 %v1397_v45, %v1312_v38  ;;  %v1378_v28 = vadd.f32 %v1377_v53, %v1311_v62 }
 0x567   :  { %v1889_v48 = vmul.f32 -1.442695, %v1398_v46 }
 0x568   :  { %v2025_v47 = vpop.eup %2024 }
 0x569   :  { %v2027_v52 = vpop.eup %2026  ;;  %v1409_v56 = vadd.f32 1.0, %v2025_v47  ;;  %2028 = vpow2.f32 %v1889_v48 }
 0x56a   :  { %v1410_v50 = vadd.f32 1.0, %v2027_v52  ;;  %v3325_v52 = vld [vmem:[#allocation32_spill] sm:$0xff] }
 0x56b   :  { %2030 = vrcp.f32 %v1409_v56  ;;  %v1423_v25 = vand.u32 2147483648, %v1409_v56  ;;  %v1421_v40 = vand.u32 2147483647, %v1409_v56  ;;  %vm1417_vm15 = vweird.f32 %v1409_v56 }
 0x56c   :  { %2032 = vrcp.f32 %v1410_v50  ;;  %v1438_v54 = vand.u32 2147483648, %v1410_v50  ;;  %v1436_v6 = vand.u32 2147483647, %v1410_v50  ;;  %vm1432_vm0 = vweird.f32 %v1410_v50 }
 0x56d   :  { %v1424_v51 = vor.u32 1.1754944e-38, %v1423_v25  ;;  %vm1422_vm3 = vcmp.eq.f32.partialorder %v1421_v40, 8.507059e+37 }
 0x56e   :  { %v1439_v58 = vor.u32 1.1754944e-38, %v1438_v54  ;;  %vm1437_vm4 = vcmp.eq.f32.partialorder %v1436_v6, 8.507059e+37 }
 0x56f   :  { %v2029_v59 = vpop.eup %2028 }
 0x570   :  { %v1411_v44 = vadd.f32 1.0, %v2029_v59 }
 0x571   :  { %v2031_v61 = vpop.eup %2030 }
 0x572   :  { %v2033_v12 = vpop.eup %2032  ;;  %v1413_v7 = vmul.f32 %v2031_v61, %v1409_v56  ;;  %2034 = vrcp.f32 %v1411_v44  ;;  %vm1418_vm12 = vweird.f32 %v2031_v61  ;;  %v1453_v63 = vand.u32 2147483648, %v1411_v44 }
 0x573   :  { %v1428_v1 = vmul.f32 %v2033_v12, %v1410_v50  ;;  %2036 = vtanh.f32 %v1378_v28  ;;  %vm1433_vm13 = vweird.f32 %v2033_v12  ;;  %vm1419_vm1 = vmor %vm1417_vm15, %vm1418_vm12  ;;  %vm1447_vm6 = vweird.f32 %v1411_v44 }
 0x574   :  { %v1414_v9 = vsub.f32 1.0, %v1413_v7  ;;  %vm1434_vm2 = vmor %vm1432_vm0, %vm1433_vm13  ;;  %v1451_v15 = vand.u32 2147483647, %v1411_v44  ;;  %v1454_v33 = vor.u32 1.1754944e-38, %v1453_v63 }
 0x575   :  { %v1429_v10 = vsub.f32 1.0, %v1428_v1 }
 0x576   :  { %v1415_v23 = vmul.f32 %v2031_v61, %v1414_v9  ;;  %vm1452_vm8 = vcmp.eq.f32.partialorder %v1451_v15, 8.507059e+37  ;;  %v1765_v15 = vld [vmem:[%s3147_s3 + $0x50] sm:$0xff] }
 0x577   :  { %v1430_v17 = vmul.f32 %v2033_v12, %v1429_v10 }
 0x578   :  { %v2035_v49 = vpop.eup %2034  ;;  %v1416_v57 = vadd.f32 %v2031_v61, %v1415_v23 }
 0x579   :  { %v1431_v19 = vadd.f32 %v2033_v12, %v1430_v17  ;;  %v1443_v21 = vmul.f32 %v2035_v49, %v1411_v44  ;;  %v2037_v29 = vpop.eup %2036  ;;  %vm1448_vm5 = vweird.f32 %v2035_v49 }
 0x57a   :  { %v1420_v31 = vsel %vm1419_vm1, %v2031_v61, %v1416_v57  ;;  %vm1449_vm7 = vmor %vm1447_vm6, %vm1448_vm5 }
 0x57b   :  { %v1425_v60 = vsel %vm1422_vm3, %v1424_v51, %v1420_v31  ;;  %v1435_v32 = vsel %vm1434_vm2, %v2033_v12, %v1431_v19  ;;  %v1444_v35 = vsub.f32 1.0, %v1443_v21 }
 0x57c   :  { %v1440_v20 = vsel %vm1437_vm4, %v1439_v58, %v1435_v32  ;;  %v1459_v24 = vmul.f32 %v2037_v29, %v1425_v60 }
 0x57d   :  { %v1458_v39 = vmul.f32 %v1440_v20, %v3055_v43  ;;  %v1445_v11 = vmul.f32 %v2035_v49, %v1444_v35 }
 0x57f   :  { %v3075_v34 = vadd.f32 %v1459_v24, %v1458_v39  ;;  %v1446_v22 = vadd.f32 %v2035_v49, %v1445_v11 }
 0x581   :  { %2038 = vtanh.f32 %v3075_v34  ;;  %v1450_v16 = vsel %vm1449_vm7, %v2035_v49, %v1446_v22 }
 0x582   :  { %v1455_v3 = vsel %vm1452_vm8, %v1454_v33, %v1450_v16  ;;  %v1764_v16 = vld [vmem:[%s3147_s3 + $0x48] sm:$0xff]  ;;  %v1763_v33 = vld [vmem:[%s3147_s3 + $0x40] sm:$0xff] }
 0x587   :  { %v2039_v13 = vpop.eup %2038 }
 0x588   :  { %v1462_v8 = vmul.f32 %v2039_v13, %v1455_v3  ;;  %v1762_v13 = vld [vmem:[%s3147_s3 + $0x38] sm:$0xff] }
 0x58a   :  { %1890 = vmatmul.msk.f32.vlgmr.msra.gmra.mxu0 %vm234_vm14, %v1462_v8  ;;  %1891 = vmatmul.msk.f32.vlgmr.msra.gmra.mxu1 %vm234_vm14, %v1462_v8 }
 0x58b   :  { %1892 = vmatmul.msk.f32.vlgmr.msrb.gmra.mxu2 %vm234_vm14, %v1462_v8  ;;  %1893 = vmatmul.msk.f32.vlgmr.msrb.gmra.mxu3 %vm234_vm14, %v1462_v8 }
 0x607   :  { %v1483_v43 = vpop.f32.mrf.mxu0  ;;  %v1503_v26 = vpop.f32.mrf.mxu1 }
 0x608   :  { %v1484_v18 = vadd.f32 %v1483_v43, %v3322_v5  ;;  %v1504_v27 = vadd.f32 %v1503_v26, %v3323_v0  ;;  %v1761_v43 = vld [vmem:[%s3147_s3 + $0x30] sm:$0xff] }
 0x60a   :  { %v1894_v55 = vmul.f32 -1.442695, %v1484_v18  ;;  %v1895_v2 = vmul.f32 -1.442695, %v1504_v27  ;;  %v1760_v27 = vld [vmem:[%s3147_s3 + $0x28] sm:$0xff] }
 0x60c   :  { %2040 = vpow2.f32 %v1894_v55 }
 0x60d   :  { %2042 = vpow2.f32 %v1895_v2 }
 0x60e   :  { %v1543_v4 = vpop.f32.mrf.mxu3  ;;  %v1523_v45 = vpop.f32.mrf.mxu2 }
 0x60f   :  { %v1544_v30 = vadd.f32 %v1543_v4, %v3324_v14  ;;  %v1524_v56 = vadd.f32 %v1523_v45, %v3325_v52  ;;  %v1759_v4 = vld [vmem:[%s3147_s3 + $0x20] sm:$0xff] }
 0x611   :  { %v1896_v36 = vmul.f32 -1.442695, %v1544_v30  ;;  %v1758_v30 = vld [vmem:[%s3147_s3 + $0x18] sm:$0xff] }
 0x612   :  { %v2041_v41 = vpop.eup %2040 }
 0x613   :  { %v2043_v37 = vpop.eup %2042  ;;  %v1555_v42 = vadd.f32 1.0, %v2041_v41  ;;  %2044 = vpow2.f32 %v1896_v36  ;;  %v1756_v41 = vld [vmem:[%s3147_s3 + $0x8] sm:$0xff] }
 0x614   :  { %v1556_v38 = vadd.f32 1.0, %v2043_v37 }
 0x615   :  { %2046 = vrcp.f32 %v1555_v42  ;;  %v1569_v61 = vand.u32 2147483648, %v1555_v42  ;;  %v1567_v7 = vand.u32 2147483647, %v1555_v42  ;;  %vm1563_vm11 = vweird.f32 %v1555_v42 }
 0x616   :  { %2048 = vrcp.f32 %v1556_v38  ;;  %v1584_v28 = vand.u32 2147483648, %v1556_v38  ;;  %v1582_v9 = vand.u32 2147483647, %v1556_v38  ;;  %vm1578_vm12 = vweird.f32 %v1556_v38 }
 0x617   :  { %v1570_v54 = vor.u32 1.1754944e-38, %v1569_v61  ;;  %vm1568_vm0 = vcmp.eq.f32.partialorder %v1567_v7, 8.507059e+37 }
 0x618   :  { %v1585_v17 = vor.u32 1.1754944e-38, %v1584_v28  ;;  %vm1583_vm1 = vcmp.eq.f32.partialorder %v1582_v9, 8.507059e+37 }
 0x619   :  { %v2045_v46 = vpop.eup %2044 }
 0x61a   :  { %v1557_v48 = vadd.f32 1.0, %v2045_v46 }
 0x61b   :  { %v2047_v47 = vpop.eup %2046 }
 0x61c   :  { %v2049_v50 = vpop.eup %2048  ;;  %v1559_v53 = vmul.f32 %v2047_v47, %v1555_v42  ;;  %2050 = vrcp.f32 %v1557_v48  ;;  %vm1564_vm9 = vweird.f32 %v2047_v47  ;;  %v1599_v35 = vand.u32 2147483648, %v1557_v48  ;;  %v1755_v42 = vld [vmem:[%s3147_s3] sm:$0xff] }
 0x61d   :  { %v1574_v59 = vmul.f32 %v2049_v50, %v1556_v38  ;;  %2052 = vtanh.f32 %v1524_v56  ;;  %vm1579_vm10 = vweird.f32 %v2049_v50  ;;  %vm1565_vm13 = vmor %vm1563_vm11, %vm1564_vm9  ;;  %vm1593_vm3 = vweird.f32 %v1557_v48 }
 0x61e   :  { %v1560_v62 = vsub.f32 1.0, %v1559_v53  ;;  %vm1580_vm15 = vmor %vm1578_vm12, %vm1579_vm10  ;;  %v1597_v20 = vand.u32 2147483647, %v1557_v48  ;;  %v1600_v39 = vor.u32 1.1754944e-38, %v1599_v35 }
 0x61f   :  { %v1575_v44 = vsub.f32 1.0, %v1574_v59 }
 0x620   :  { %v1561_v12 = vmul.f32 %v2047_v47, %v1560_v62  ;;  %vm1598_vm5 = vcmp.eq.f32.partialorder %v1597_v20, 8.507059e+37 }
 0x621   :  { %v1576_v1 = vmul.f32 %v2049_v50, %v1575_v44 }
 0x622   :  { %v2051_v10 = vpop.eup %2050  ;;  %v1562_v25 = vadd.f32 %v2047_v47, %v1561_v12 }
 0x623   :  { %v1577_v23 = vadd.f32 %v2049_v50, %v1576_v1  ;;  %v1589_v40 = vmul.f32 %v2051_v10, %v1557_v48  ;;  %v2053_v49 = vpop.eup %2052  ;;  %vm1594_vm2 = vweird.f32 %v2051_v10 }
 0x624   :  { %v1566_v6 = vsel %vm1565_vm13, %v2047_v47, %v1562_v25  ;;  %vm1595_vm4 = vmor %vm1593_vm3, %vm1594_vm2  ;;  %vm1794_vm3 = vcmask 254976  }
 0x625   :  { %v1571_v57 = vsel %vm1568_vm0, %v1570_v54, %v1566_v6  ;;  %v1581_v51 = vsel %vm1580_vm15, %v2049_v50, %v1577_v23  ;;  %v1590_v19 = vsub.f32 1.0, %v1589_v40 }
 0x626   :  { %v1586_v21 = vsel %vm1583_vm1, %v1585_v17, %v1581_v51  ;;  %v1605_v58 = vmul.f32 %v2053_v49, %v1571_v57 }
 0x627   :  { %v1604_v31 = vmul.f32 %v1586_v21, %v3075_v34  ;;  %v1591_v29 = vmul.f32 %v2051_v10, %v1590_v19  ;;  %v1766_v34 = vld [vmem:[%s3147_s3 + $0x58] sm:$0xff] }
 0x628   :  { %1776 = vmatpush.msra.mxu0 %v1766_v34 }
 0x629   :  { %v3087_v60 = vadd.f32 %v1605_v58, %v1604_v31  ;;  %v1592_v32 = vadd.f32 %v2051_v10, %v1591_v29 }
 0x62a   :  { %1777 = vmatpush.msra.mxu0 %v1765_v15 }
 0x62b   :  { %2054 = vtanh.f32 %v3087_v60  ;;  %v1596_v24 = vsel %vm1595_vm4, %v2051_v10, %v1592_v32 }
 0x62c   :  { %v1601_v22 = vsel %vm1598_vm5, %v1600_v39, %v1596_v24  ;;  %1778 = vmatpush.msra.mxu0 %v1764_v16 }
 0x62e   :  { %1779 = vmatpush.msra.mxu0 %v1763_v33 }
 0x630   :  { %1780 = vmatpush.msra.mxu0 %v1762_v13 }
 0x631   :  { %v2055_v11 = vpop.eup %2054 }
 0x632   :  { %v1608_v63 = vmul.f32 %v2055_v11, %v1601_v22  ;;  %1781 = vmatpush.msra.mxu0 %v1761_v43 }
 0x634   :  { %1897 = vmatmul.msk.f32.vlgmr.msrb.gmra.mxu0 %vm234_vm14, %v1608_v63  ;;  %1898 = vmatmul.msk.f32.vlgmr.msrb.gmra.mxu1 %vm234_vm14, %v1608_v63 }
 0x635   :  { %1899 = vmatmul.msk.f32.vlgmr.msra.gmra.mxu2 %vm234_vm14, %v1608_v63  ;;  %1900 = vmatmul.msk.f32.vlgmr.msra.gmra.mxu3 %vm234_vm14, %v1608_v63 }
 0x636   :  { %1782 = vmatpush.msra.mxu0 %v1760_v27 }
 0x638   :  { %1783 = vmatpush.msra.mxu0 %v1759_v4 }
 0x63a   :  { %1784 = vmatpush.msra.mxu0 %v1758_v30 }
 0x6b1   :  { %v1629_v3 = vpop.f32.mrf.mxu0  ;;  %v1649_v8 = vpop.f32.mrf.mxu1 }
 0x6b2   :  { %v1630_v26 = vadd.f32 %v1629_v3, %v3322_v5  ;;  %v1650_v18 = vadd.f32 %v1649_v8, %v3323_v0  ;;  %v1757_v5 = vld [vmem:[%s3147_s3 + $0x10] sm:$0xff] }
 0x6b3   :  { %1785 = vmatpush.msra.mxu0 %v1757_v5 }
 0x6b4   :  { %v1901_v55 = vmul.f32 -1.442695, %v1630_v26  ;;  %v1902_v2 = vmul.f32 -1.442695, %v1650_v18 }
 0x6b5   :  { %1786 = vmatpush.msra.mxu0 %v1756_v41 }
 0x6b6   :  { %2056 = vpow2.f32 %v1901_v55 }
 0x6b7   :  { %2058 = vpow2.f32 %v1902_v2  ;;  %1787 = vmatpush.msra.mxu0 %v1755_v42 }
 0x6b8   :  { %v1689_v0 = vpop.f32.mrf.mxu3 }
 0x6b9   :  { %v1690_v36 = vadd.f32 %v1689_v0, %v3324_v14  ;;  %v1669_v14 = vpop.f32.mrf.mxu2 }
 0x6ba   :  { %v1670_v53 = vadd.f32 %v1669_v14, %v3325_v52 }
 0x6bb   :  { %v1903_v37 = vmul.f32 -1.442695, %v1690_v36 }
 0x6bc   :  { %v2057_v38 = vpop.eup %2056 }
 0x6bd   :  { %v2059_v45 = vpop.eup %2058  ;;  %v1701_v46 = vadd.f32 1.0, %v2057_v38  ;;  %2060 = vpow2.f32 %v1903_v37 }
 0x6be   :  { %v1702_v48 = vadd.f32 1.0, %v2059_v45 }
 0x6bf   :  { %2062 = vrcp.f32 %v1701_v46  ;;  %v1715_v12 = vand.u32 2147483648, %v1701_v46  ;;  %v1713_v9 = vand.u32 2147483647, %v1701_v46  ;;  %vm1709_vm8 = vweird.f32 %v1701_v46 }
 0x6c0   :  { %2064 = vrcp.f32 %v1702_v48  ;;  %v1730_v7 = vand.u32 2147483648, %v1702_v48  ;;  %v1728_v25 = vand.u32 2147483647, %v1702_v48  ;;  %vm1724_vm9 = vweird.f32 %v1702_v48 }
 0x6c1   :  { %v1716_v52 = vor.u32 1.1754944e-38, %v1715_v12  ;;  %vm1714_vm12 = vcmp.eq.f32.partialorder %v1713_v9, 8.507059e+37 }
 0x6c2   :  { %v1731_v6 = vor.u32 1.1754944e-38, %v1730_v7  ;;  %vm1729_vm13 = vcmp.eq.f32.partialorder %v1728_v25, 8.507059e+37 }
 0x6c3   :  { %v2061_v47 = vpop.eup %2060 }
 0x6c4   :  { %v1703_v56 = vadd.f32 1.0, %v2061_v47 }
 0x6c5   :  { %v2063_v50 = vpop.eup %2062 }
 0x6c6   :  { %v2065_v59 = vpop.eup %2064  ;;  %v1705_v62 = vmul.f32 %v2063_v50, %v1701_v46  ;;  %2066 = vrcp.f32 %v1703_v56  ;;  %vm1710_vm6 = vweird.f32 %v2063_v50  ;;  %v1745_v24 = vand.u32 2147483648, %v1703_v56 }
 0x6c7   :  { %v1720_v44 = vmul.f32 %v2065_v59, %v1702_v48  ;;  %2068 = vtanh.f32 %v1670_v53  ;;  %vm1725_vm7 = vweird.f32 %v2065_v59  ;;  %vm1711_vm10 = vmor %vm1709_vm8, %vm1710_vm6  ;;  %vm1739_vm0 = vweird.f32 %v1703_v56 }
 0x6c8   :  { %v1706_v61 = vsub.f32 1.0, %v1705_v62  ;;  %vm1726_vm11 = vmor %vm1724_vm9, %vm1725_vm7  ;;  %v1743_v39 = vand.u32 2147483647, %v1703_v56  ;;  %v1746_v22 = vor.u32 1.1754944e-38, %v1745_v24 }
 0x6c9   :  { %v1721_v28 = vsub.f32 1.0, %v1720_v44 }
 0x6ca   :  { %v1707_v1 = vmul.f32 %v2063_v50, %v1706_v61  ;;  %vm1744_vm2 = vcmp.eq.f32.partialorder %v1743_v39, 8.507059e+37 }
 0x6cb   :  { %v1722_v10 = vmul.f32 %v2065_v59, %v1721_v28 }
 0x6cc   :  { %v2067_v54 = vpop.eup %2066  ;;  %v1708_v23 = vadd.f32 %v2063_v50, %v1707_v1 }
 0x6cd   :  { %v1723_v40 = vadd.f32 %v2065_v59, %v1722_v10  ;;  %v1735_v17 = vmul.f32 %v2067_v54, %v1703_v56  ;;  %v2069_v57 = vpop.eup %2068  ;;  %vm1740_vm15 = vweird.f32 %v2067_v54 }
 0x6ce   :  { %v1712_v49 = vsel %vm1711_vm10, %v2063_v50, %v1708_v23  ;;  %vm1741_vm1 = vmor %vm1739_vm0, %vm1740_vm15 }
 0x6cf   :  { %v1717_v51 = vsel %vm1714_vm12, %v1716_v52, %v1712_v49  ;;  %v1727_v19 = vsel %vm1726_vm11, %v2065_v59, %v1723_v40  ;;  %v1736_v21 = vsub.f32 1.0, %v1735_v17 }
 0x6d0   :  { %v1732_v58 = vsel %vm1729_vm13, %v1731_v6, %v1727_v19  ;;  %v1751_v31 = vmul.f32 %v2069_v57, %v1717_v51 }
 0x6d1   :  { %v1750_v29 = vmul.f32 %v1732_v58, %v3087_v60  ;;  %v1737_v32 = vmul.f32 %v2067_v54, %v1736_v21  ;;  %v1911_v60 = vld [vmem:[%s3147_s3 + $0x60] ss:$0 sm:$0xff]  ;;  %s1815_s3 = sshll.u32 %s2245_s2, 4  ;;  %s1816_s3 = int_to_ptr.vmem [resolvable:$true] %s1815_s3 }
 0x6d3   :  { %v1752_v35 = vadd.f32 %v1751_v31, %v1750_v29  ;;  %v1738_v20 = vadd.f32 %v2067_v54, %v1737_v32 }
 0x6d5   :  { %2070 = vtanh.f32 %v1752_v35  ;;  %v1742_v11 = vsel %vm1741_vm1, %v2067_v54, %v1738_v20 }
 0x6d6   :  { %v1747_v34 = vsel %vm1744_vm2, %v1746_v22, %v1742_v11 }
 0x6db   :  { %v2071_v63 = vpop.eup %2070 }
 0x6dc   :  { %v1754_v15 = vmul.f32 %v2071_v63, %v1747_v34 }
 0x6de   :  { %1904 = vmatmul.msk.f32.vlgmr.msra.gmra.mxu0 %vm234_vm14, %v1754_v15 }
 0x75b   :  { %v1789_v16 = vpop.f32.mrf.mxu0 }
 0x75c   :  { %v1790_v33 = vadd.f32 %v1911_v60, %v1789_v16 }
 0x75e   :  { %v1792_v13 = vmax.f32 %v1790_v33, 0.0 }
 0x760   :  { %v1793_v3 = vmul.f32 %v1792_v13, %v1792_v13 }
 0x762   :  { %v1795_v8 = vsel %vm1794_vm3, %v1793_v3, 0.0 }
 0x763   :  { %1796 = vadd.xlane.f32.xlu0 %v1795_v8 }
 0x7d6   :  { %v1797_v43 = vpop.xlane.xlu0 %1796 }
 0x7d7   :  { %2072 = vrsqrt.f32 %v1797_v43  ;;  %vm1804_vm4 = vweird.f32 %v1797_v43 }
 0x7dd   :  { %v2073_v26 = vpop.eup %2072 }
 0x7de   :  { %v1799_v18 = vmul.f32 %v2073_v26, %v1797_v43  ;;  %vm1805_vm14 = vweird.f32 %v2073_v26 }
 0x7df   :  { %vm1806_vm5 = vmor %vm1804_vm4, %vm1805_vm14 }
 0x7e0   :  { %v1800_v27 = vmul.f32 %v2073_v26, %v1799_v18 }
 0x7e2   :  { %v1801_v55 = vmul.f32 0.5, %v1800_v27 }
 0x7e4   :  { %v1802_v2 = vsub.f32 1.5, %v1801_v55 }
 0x7e6   :  { %v1803_v4 = vmul.f32 %v2073_v26, %v1802_v2 }
 0x7e8   :  { %v1807_v30 = vsel %vm1806_vm5, %v2073_v26, %v1803_v4 }
 0x7e9   :  { %v1808_v5 = vmul.f32 %v1807_v30, %v1792_v13 }
 0x7eb   :  { %1809 = vst.msk [vmem:[#allocation7] sm:$0x3] %vm1794_vm3, %v1808_v5 }
 0x7ec   :  { %1820 = dma.vmem_to_hbm [thread:$0]  %s1816_s3, 32, %s1818_s0, [#allocation4]  }
 0x7ed   :  { %2238 = dma.done.wait [#allocation4], 32  }
 0x7ee   :  { %2239 = vsyncadd [#allocation4], 4294967264 }
 0x7ef   :  { %1825 = vsyncpa [#allocation3], 1 }
 0x7f0   :  { %1826 = vsyncpa [#allocation6], 1 }
 0x7f1   :  { %1827 = vsyncpa [#allocation4], 1 }

</bundles_post_ra>
